<compile_context>
chip_gen: v6e
topology: v6e:2x2x1
jax: 0.10.0
libtpu: 0.0.40
codegen_flags: <defaults>
</compile_context>

<pallas_src>
import functools
import math
import sys

import jax
import jax.numpy as jnp
from jax.experimental import pallas as pl
from jax.experimental.pallas import tpu as pltpu

MIN_STD = 1e-8
_LANE = 128
_SUBLANE = 8

# Per-block byte targets. The eps path streams 4 full-size arrays (mu, rho,
# eps in; weight out), the PRNG / KL-only paths 3 / 2, all double-buffered by
# BlockSpec. With the explicit 48 MiB scoped-VMEM limit these fit comfortably
# on v5e/v6e (128 MiB physical) and v7x (64 MiB physical).
_BLOCK_BYTES_EPS = 2 * 1024 * 1024
_BLOCK_BYTES_PRNG = 4 * 1024 * 1024
_VMEM_LIMIT_BYTES = 48 * 1024 * 1024   # > v5e's 16 MiB default, < v7x 64 MiB

_CPARAMS = pltpu.CompilerParams(
    dimension_semantics=("parallel", "parallel"),
    vmem_limit_bytes=_VMEM_LIMIT_BYTES)


# ---------------------------------------------------------------------------
# Tile-size selection
# ---------------------------------------------------------------------------
def _choose_tile_n(n, itemsize, block_bytes):
    """Split the lane dim only when even 8 rows of the full width exceed the
    per-block budget (e.g. conv weights flattened to a very wide C_in*k*k)."""
    if n * itemsize * _SUBLANE <= block_bytes or n % _LANE != 0:
        return n
    cap = max(_LANE, block_bytes // (_SUBLANE * itemsize))
    for mult in range(min(n, cap) // _LANE, 0, -1):
        cand = mult * _LANE
        if n % cand == 0:
            return cand
    return n


def _choose_tile_m(m, tile_n, itemsize, block_bytes):
    """Row-tile size: prefer a divisor of m (skips the ragged-tile mask) and,
    among those, an even tile count (even split across v7x's 2 TensorCores)."""
    if m <= _SUBLANE:
        return m
    rows = block_bytes // max(1, tile_n * itemsize)
    rows = max(_SUBLANE, min(m, (rows // _SUBLANE) * _SUBLANE))
    divisors = [d for d in range(_SUBLANE, rows + 1, _SUBLANE) if m % d == 0]
    even = [d for d in divisors if (m // d) % 2 == 0]
    if even:
        return max(even)
    if divisors:
        return max(divisors)
    return m if rows >= m else rows


def _flatten2d(a):
    return a.reshape(1, -1) if a.ndim == 1 else a.reshape(a.shape[0], -1)


def _kl_consts(prior_mu, prior_sigma, min_std, rows_total, tile_m):
    return dict(
        min_std=float(min_std),
        kl_const=2.0 * math.log(float(prior_sigma)) - 1.0,
        inv_prior_var=1.0 / float(prior_sigma) ** 2,
        prior_mu=float(prior_mu),
        rows_total=int(rows_total),
        tile_m=int(tile_m))


# ---------------------------------------------------------------------------
# Fused tile body: reparameterized sample + per-tile KL partial
# ---------------------------------------------------------------------------
def _tile_body(mu, rho, eps, w_ref, klp_ref, *, min_std, kl_const,
               inv_prior_var, prior_mu, rows_total, tile_m):
    # sigma = softplus(rho) + min_std  (two EUP transcendentals, no zeros tile)
    sigma = jax.nn.softplus(rho) + min_std
    if w_ref is not None:
        # Reparameterized Normal(mu, sigma) sample.
        w_ref[...] = (mu + sigma * eps).astype(w_ref.dtype)
    # KL(N(mu, sigma) || N(prior_mu, prior_sigma)), strength-reduced so the
    # only per-element transcendental left is one log; the prior constants are
    # folded at trace time:
    #   (2*log(sp) - 1) - 2*log(sq) + (sq^2 + (mu_q - mu_p)^2) / sp^2
    dmu = mu - prior_mu
    term = (kl_const - 2.0 * jnp.log(sigma)
            + (sigma * sigma + dmu * dmu) * inv_prior_var).astype(jnp.float32)
    if rows_total % tile_m != 0:
        # Ragged last row-tile: mask padded-garbage rows out of the reduction
        # with a select (OOB weight stores are dropped by Pallas).
        row = (pl.program_id(0) * tile_m
               + jax.lax.broadcasted_iota(jnp.int32, term.shape, 0))
        term = jnp.where(row < rows_total, term, 0.0)
    # Per-lane partial sum (sublane reduce, f32 accumulation). The tiny
    # cross-tile / cross-lane reduction happens in plain jnp outside the
    # kernel, keeping both grid axes fully "parallel" (v7x megacore sharding).
    partial = 0.5 * jnp.sum(term, axis=0, keepdims=True)
    klp_ref[...] = partial.reshape(klp_ref.shape)


def _eps_kernel(mu_ref, rho_ref, eps_ref, w_ref, klp_ref, **consts):
    _tile_body(mu_ref[...], rho_ref[...], eps_ref[...], w_ref, klp_ref, **consts)


def _prng_kernel(seed_ref, mu_ref, rho_ref, w_ref, klp_ref, **consts):
    # One decorrelated stream per grid tile (single combined int32 seed).
    tile_id = pl.program_id(0) * pl.num_programs(1) + pl.program_id(1)
    pltpu.prng_seed(seed_ref[0] + tile_id)
    eps = pltpu.stateful_normal(mu_ref.shape, jnp.float32)
    _tile_body(mu_ref[...], rho_ref[...], eps.astype(mu_ref.dtype), w_ref,
               klp_ref, **consts)


def _kl_kernel(mu_ref, rho_ref, klp_ref, **consts):
    _tile_body(mu_ref[...], rho_ref[...], None, None, klp_ref, **consts)


# ---------------------------------------------------------------------------
# pallas_call builders
# ---------------------------------------------------------------------------
def _specs(m2, n2, tm, tn):
    num_mt, num_nt = pl.cdiv(m2, tm), n2 // tn
    io_map = lambda i, j, *_: (i, j)          # *_ swallows scalar-prefetch refs
    klp_map = lambda i, j, *_: (i, 0, j)
    in_spec = pl.BlockSpec((tm, tn), io_map)
    klp_spec = pl.BlockSpec((1, 1, tn), klp_map)
    klp_shape = jax.ShapeDtypeStruct((num_mt, 1, n2), jnp.float32)
    return (num_mt, num_nt), in_spec, klp_spec, klp_shape


def _run_eps_kernel(mu2, rho2, eps2, tm, tn, consts):
    m2, n2 = mu2.shape
    grid, in_spec, klp_spec, klp_shape = _specs(m2, n2, tm, tn)
    n_el, isz = m2 * n2, mu2.dtype.itemsize
    return pl.pallas_call(
        functools.partial(_eps_kernel, **consts),
        grid=grid,
        in_specs=[in_spec, in_spec, in_spec],
        out_specs=(in_spec, klp_spec),
        out_shape=(jax.ShapeDtypeStruct((m2, n2), mu2.dtype), klp_shape),
        compiler_params=_CPARAMS,
        cost_estimate=pl.CostEstimate(flops=12 * n_el, transcendentals=3 * n_el,
                                      bytes_accessed=4 * isz * n_el),
    )(mu2, rho2, eps2)


def _run_prng_kernel(mu2, rho2, seed, tm, tn, consts):
    m2, n2 = mu2.shape
    grid, in_spec, klp_spec, klp_shape = _specs(m2, n2, tm, tn)
    n_el, isz = m2 * n2, mu2.dtype.itemsize
    grid_spec = pltpu.PrefetchScalarGridSpec(
        num_scalar_prefetch=1, grid=grid,
        in_specs=[in_spec, in_spec],
        out_specs=(in_spec, klp_spec))
    return pl.pallas_call(
        functools.partial(_prng_kernel, **consts),
        grid_spec=grid_spec,
        out_shape=(jax.ShapeDtypeStruct((m2, n2), mu2.dtype), klp_shape),
        compiler_params=_CPARAMS,
        cost_estimate=pl.CostEstimate(flops=16 * n_el, transcendentals=4 * n_el,
                                      bytes_accessed=3 * isz * n_el),
    )(jnp.asarray([seed], jnp.int32), mu2, rho2)


def _run_kl_kernel(mu2, rho2, tm, tn, consts):
    m2, n2 = mu2.shape
    grid, in_spec, klp_spec, klp_shape = _specs(m2, n2, tm, tn)
    n_el, isz = m2 * n2, mu2.dtype.itemsize
    return pl.pallas_call(
        functools.partial(_kl_kernel, **consts),
        grid=grid,
        in_specs=[in_spec, in_spec],
        out_specs=klp_spec,
        out_shape=klp_shape,
        compiler_params=_CPARAMS,
        cost_estimate=pl.CostEstimate(flops=8 * n_el, transcendentals=2 * n_el,
                                      bytes_accessed=2 * isz * n_el),
    )(mu2, rho2)


# ---------------------------------------------------------------------------
# One-time probe: is the TPU stateful PRNG available on this build?
# ---------------------------------------------------------------------------
_PRNG_OK = None


def _tpu_prng_available():
    global _PRNG_OK
    if _PRNG_OK is None:
        try:
            z = jnp.zeros((_SUBLANE, _LANE), jnp.float32)
            w, klp = _run_prng_kernel(
                z, z, 0, _SUBLANE, _LANE,
                _kl_consts(0.0, 1.0, MIN_STD, _SUBLANE, _SUBLANE))
            jax.block_until_ready((w, klp))
            _PRNG_OK = bool(jnp.all(jnp.isfinite(w)))
        except Exception as e:  # noqa: BLE001 - optional fast path only
            print(f"note: in-kernel TPU PRNG unavailable "
                  f"({type(e).__name__}: {e}); using jax.random eps path",
                  file=sys.stderr)
            _PRNG_OK = False
    return _PRNG_OK


# ---------------------------------------------------------------------------
# Host-level fused ops
# ---------------------------------------------------------------------------
def sample_and_kl(mu, rho, *, prior_mu, prior_sigma, min_std=MIN_STD,
                  eps=None, seed=None, tile_m=None):
    """Fused reparameterized sample + KL(q || N(prior_mu, prior_sigma)).

    weight = mu + (softplus(rho) + min_std) * eps. If `eps` is None the noise
    is drawn in-kernel by the TPU hardware PRNG seeded by `seed` (default,
    fastest: one fewer full-size HBM stream). Returns (weight, kl_sum).
    """
    if eps is None and seed is None:
        raise ValueError("provide either `eps` or `seed`")
    if eps is None and not _tpu_prng_available():
        eps = jax.random.normal(jax.random.PRNGKey(int(seed)), mu.shape, mu.dtype)

    orig_shape = mu.shape
    mu2 = _flatten2d(mu)
    rho2 = rho.reshape(mu2.shape)
    m2, n2 = mu2.shape
    isz = mu2.dtype.itemsize
    block_bytes = _BLOCK_BYTES_PRNG if eps is None else _BLOCK_BYTES_EPS
    tn = _choose_tile_n(n2, isz, block_bytes)
    tm = int(tile_m) if tile_m is not None else _choose_tile_m(m2, tn, isz,
                                                               block_bytes)
    consts = _kl_consts(prior_mu, prior_sigma, min_std, m2, tm)

    if eps is None:
        w2, klp = _run_prng_kernel(mu2, rho2, int(seed), tm, tn, consts)
    else:
        w2, klp = _run_eps_kernel(mu2, rho2, eps.reshape(mu2.shape), tm, tn,
                                  consts)
    return w2.reshape(orig_shape), jnp.sum(klp)


def kl_only(mu, rho, *, prior_mu, prior_sigma, min_std=MIN_STD, tile_m=None):
    """KL(q || prior) only: reads mu/rho once, writes only tiny per-tile
    partials (no eps read, no discarded full-size weight write)."""
    mu2 = _flatten2d(mu)
    rho2 = rho.reshape(mu2.shape)
    m2, n2 = mu2.shape
    isz = mu2.dtype.itemsize
    tn = _choose_tile_n(n2, isz, _BLOCK_BYTES_PRNG)
    tm = int(tile_m) if tile_m is not None else _choose_tile_m(m2, tn, isz,
                                                               _BLOCK_BYTES_PRNG)
    consts = _kl_consts(prior_mu, prior_sigma, min_std, m2, tm)
    return jnp.sum(_run_kl_kernel(mu2, rho2, tm, tn, consts))


# ---------------------------------------------------------------------------
# Plain-jnp reference helpers (also used for the tiny bias path)
# ---------------------------------------------------------------------------
def _sigma_ref(rho, min_std=MIN_STD):
    return jax.nn.softplus(rho) + min_std


def _kl_ref(mu_q, sig_q, mu_p, sig_p):
    return 0.5 * jnp.sum(2.0 * jnp.log(sig_p / sig_q) - 1.0
                         + (sig_q / sig_p) ** 2 + ((mu_p - mu_q) / sig_p) ** 2)


# ---------------------------------------------------------------------------
# Module-level wrapper mirroring DiagPriorModule semantics
# ---------------------------------------------------------------------------
class DiagPriorPallas:
    def __init__(self, shape, bias=True, priors=None, key=None):
        priors_def = {
            "prior_mu": 0.0, "prior_sigma": 0.1,
            "prior_bias_mu": 0.0, "prior_bias_sigma": 1.0,
            "posterior_mu_initial": (0.0, 0.1),
            "posterior_rho_initial": (-3.0, 0.1),
        }
        if priors:
            priors_def.update(priors)
        p = priors_def
        self.prior_mu = p["prior_mu"]
        self.prior_sigma = p["prior_sigma"]
        self.prior_bias_mu = p["prior_bias_mu"]
        self.prior_bias_sigma = p["prior_bias_sigma"]
        self.use_bias = bias
        self.min_std = MIN_STD

        key = jax.random.PRNGKey(0) if key is None else key
        k1, k2, k3, k4 = jax.random.split(key, 4)
        mu0, mu_std = p["posterior_mu_initial"]
        rho0, rho_std = p["posterior_rho_initial"]
        self.weight_mu = mu0 + mu_std * jax.random.normal(k1, shape, jnp.float32)
        self.weight_rho = rho0 + rho_std * jax.random.normal(k2, shape, jnp.float32)
        if bias:
            self.bias_mu = 1e-8 * jax.random.normal(k3, (shape[0],), jnp.float32)
            self.bias_rho = rho0 + rho_std * jax.random.normal(
                k4, (shape[0],), jnp.float32)
        else:
            self.bias_mu = None
            self.bias_rho = None
        self._kl = None

    def _bias_sample_and_kl(self, key):
        # Bias is a tiny (C_out,) vector: a dedicated pallas_call is pure
        # launch/pipeline overhead, so it stays in plain jnp.
        sig_b = _sigma_ref(self.bias_rho, self.min_std)
        eps_b = jax.random.normal(key, self.bias_mu.shape, jnp.float32)
        bias = self.bias_mu + sig_b * eps_b
        kl_b = _kl_ref(self.bias_mu, sig_b, self.prior_bias_mu,
                       self.prior_bias_sigma)
        return bias, kl_b

    def forward(self, x, key=None, sample=True, use_tpu_prng=True, seed=0,
                tile_m=None):
        del x  # TODO(synk): `func` is abstract (`pass`) in the reference, so there is no layer computation to lower; output stays None.
        if not sample:
            self._kl = None
            return None, self.weight_mu, (self.bias_mu if self.use_bias else None)

        key = jax.random.PRNGKey(seed) if key is None else key
        kw, kb = jax.random.split(key)
        if use_tpu_prng:
            # Default: in-kernel TPU PRNG -> no full-size eps HBM write/read.
            weight, kl = sample_and_kl(
                self.weight_mu, self.weight_rho,
                prior_mu=self.prior_mu, prior_sigma=self.prior_sigma,
                min_std=self.min_std, seed=seed, tile_m=tile_m)
        else:
            eps_w = jax.random.normal(kw, self.weight_mu.shape, jnp.float32)
            weight, kl = sample_and_kl(
                self.weight_mu, self.weight_rho,
                prior_mu=self.prior_mu, prior_sigma=self.prior_sigma,
                min_std=self.min_std, eps=eps_w, tile_m=tile_m)
        bias = None
        if self.use_bias:
            bias, kl_b = self._bias_sample_and_kl(kb)
            kl = kl + kl_b
        self._kl = kl   # KL fused with the sample: mu/rho read from HBM once
        return None, weight, bias

    def get_kl(self):
        if self._kl is not None:
            return self._kl
        # Standalone KL: dedicated KL-only kernel (no eps, no discarded weight).
        kl = kl_only(self.weight_mu, self.weight_rho,
                     prior_mu=self.prior_mu, prior_sigma=self.prior_sigma,
                     min_std=self.min_std)
        if self.use_bias:
            kl = kl + _kl_ref(self.bias_mu, _sigma_ref(self.bias_rho, self.min_std),
                              self.prior_bias_mu, self.prior_bias_sigma)
        return kl


if __name__ == "__main__":
    shape = (48, 256)          # (C_out, C_in) parameter matrix (small demo)
    module = DiagPriorPallas(shape, bias=True, key=jax.random.PRNGKey(0))
    x = jax.random.normal(jax.random.PRNGKey(42), (2, shape[1]), jnp.float32)

    sig_w = _sigma_ref(module.weight_rho)
    sig_b = _sigma_ref(module.bias_rho)
    ref_kl_w = _kl_ref(module.weight_mu, sig_w, module.prior_mu, module.prior_sigma)
    ref_kl = ref_kl_w + _kl_ref(module.bias_mu, sig_b,
                                module.prior_bias_mu, module.prior_bias_sigma)

    # --- A: default forward (in-kernel TPU PRNG; auto-falls back to the eps
    #        kernel if the stateful-PRNG lowering is unavailable) ------------
    output, weight, bias = module.forward(x, key=jax.random.PRNGKey(1), seed=1234)
    kl = module.get_kl()
    jax.block_until_ready((weight, bias, kl))
    assert output is None                      # `func` is abstract -> None
    assert weight.shape == shape and bias.shape == (shape[0],)
    z = (weight - module.weight_mu) / sig_w    # implied standard-normal noise
    assert bool(jnp.all(jnp.isfinite(z)))
    assert abs(float(jnp.mean(z))) < 0.08
    assert abs(float(jnp.std(z)) - 1.0) < 0.08
    assert jnp.allclose(kl, ref_kl, rtol=1e-4, atol=1e-2)

    # --- B: explicit-eps path, bit-checkable against the jnp reference ------
    eps_w = jax.random.normal(jax.random.PRNGKey(7), shape, jnp.float32)
    w_e, kl_e = sample_and_kl(module.weight_mu, module.weight_rho,
                              prior_mu=0.0, prior_sigma=0.1, eps=eps_w)
    jax.block_until_ready((w_e, kl_e))
    assert jnp.allclose(w_e, module.weight_mu + sig_w * eps_w, atol=1e-5, rtol=1e-5)
    assert jnp.allclose(kl_e, ref_kl_w, rtol=1e-4, atol=1e-2)

    # --- C: non-sampled forward + standalone KL-only kernel -----------------
    out2, w_mu, b_mu = module.forward(x, sample=False)
    assert out2 is None and w_mu is module.weight_mu and b_mu is module.bias_mu
    kl_sa = module.get_kl()                    # no cached KL -> KL-only kernel
    jax.block_until_ready(kl_sa)
    assert jnp.allclose(kl_sa, ref_kl, rtol=1e-4, atol=1e-2)

    # --- D: ragged last row-tile (rows not a multiple of tile_m) ------------
    mu_r, rho_r, eps_r = module.weight_mu[:20], module.weight_rho[:20], eps_w[:20]
    w_r, kl_r = sample_and_kl(mu_r, rho_r, prior_mu=0.0, prior_sigma=0.1,
                              eps=eps_r, tile_m=8)
    jax.block_until_ready((w_r, kl_r))
    assert jnp.allclose(w_r, mu_r + _sigma_ref(rho_r) * eps_r, atol=1e-5, rtol=1e-5)
    assert jnp.allclose(kl_r, _kl_ref(mu_r, _sigma_ref(rho_r), 0.0, 0.1),
                        rtol=1e-4, atol=1e-2)

    print("KERNEL_OK")
</pallas_src>

<mosaic_0001>
module attributes {stable_mosaic.version = 11 : i64} {
  func.func @_prng_kernel(%arg0: i32, %arg1: i32, %arg2: memref<1xi32, #tpu.memory_space<smem>>, %arg3: memref<8x128xf32, #tpu.memory_space<vmem>>, %arg4: memref<8x128xf32, #tpu.memory_space<vmem>>, %arg5: memref<8x128xf32, #tpu.memory_space<vmem>>, %arg6: memref<1x1x128xf32, #tpu.memory_space<vmem>>) attributes {dimension_semantics = [#tpu.dimension_semantics<parallel>, #tpu.dimension_semantics<parallel>], iteration_bounds = array<i64: 1, 1>, scalar_prefetch = 1 : i64, scratch_operands = 0 : i64, tpu.core_type = #tpu.core_type<tc>, window_params = [{transform_indices = @transform_0, window_bounds = array<i64: 8, 128>}, {transform_indices = @transform_1, window_bounds = array<i64: 8, 128>}, {transform_indices = @transform_2, window_bounds = array<i64: 8, 128>}, {transform_indices = @transform_3, window_bounds = array<i64: 1, 1, 128>}]} {
    %c1_i32 = arith.constant 1 : i32
    %0 = arith.muli %arg0, %c1_i32 : i32
    %1 = arith.addi %0, %arg1 : i32
    %c0 = arith.constant 0 : index
    %2 = memref.load %arg2[%c0] : memref<1xi32, #tpu.memory_space<smem>>
    %3 = arith.addi %2, %1 : i32
    "tpu.prng_set_seed_32"(%3) : (i32) -> ()
    %c0_i32 = arith.constant 0 : i32
    %c0_i32_0 = arith.constant 0 : i32
    %cst = arith.constant -0.99999994 : f32
    %cst_1 = arith.constant 1.000000e+00 : f32
    %4 = vector.broadcast %cst : f32 to vector<1x1xf32>
    %5 = vector.broadcast %cst_1 : f32 to vector<1x1xf32>
    %6 = "tpu.prng_random_bits"() : () -> vector<8x128xi32>
    %c9_i32 = arith.constant 9 : i32
    %7 = vector.broadcast %c9_i32 : i32 to vector<8x128xi32>
    %8 = arith.shrui %6, %7 : vector<8x128xi32>
    %c1065353216_i32 = arith.constant 1065353216 : i32
    %9 = vector.broadcast %c1065353216_i32 : i32 to vector<8x128xi32>
    %10 = arith.ori %8, %9 : vector<8x128xi32>
    %11 = tpu.bitcast %10 : vector<8x128xi32> -> vector<8x128xf32>
    %cst_2 = arith.constant 1.000000e+00 : f32
    %12 = vector.broadcast %cst_2 : f32 to vector<8x128xf32>
    %13 = arith.subf %11, %12 : vector<8x128xf32>
    %14 = arith.subf %5, %4 : vector<1x1xf32>
    %15 = vector.broadcast %14 : vector<1x1xf32> to vector<8x128xf32>
    %16 = arith.mulf %13, %15 : vector<8x128xf32>
    %17 = vector.broadcast %4 : vector<1x1xf32> to vector<8x128xf32>
    %18 = arith.addf %16, %17 : vector<8x128xf32>
    %19 = vector.broadcast %4 : vector<1x1xf32> to vector<8x128xf32>
    %20 = arith.maximumf %19, %18 : vector<8x128xf32>
    %cst_3 = arith.constant 0.000000e+00 : f32
    %21 = vector.broadcast %cst_3 : f32 to vector<8x128xf32>
    %22 = arith.subf %21, %20 : vector<8x128xf32>
    %23 = arith.mulf %20, %22 : vector<8x128xf32>
    %24 = math.log1p %23 : vector<8x128xf32>
    %cst_4 = arith.constant 0.000000e+00 : f32
    %25 = vector.broadcast %cst_4 : f32 to vector<8x128xf32>
    %26 = arith.subf %25, %24 : vector<8x128xf32>
    %cst_5 = arith.constant 5.000000e+00 : f32
    %27 = vector.broadcast %cst_5 : f32 to vector<8x128xf32>
    %28 = arith.cmpf olt, %26, %27 : vector<8x128xf32>
    %cst_6 = arith.constant 2.500000e+00 : f32
    %29 = vector.broadcast %cst_6 : f32 to vector<8x128xf32>
    %30 = arith.subf %26, %29 : vector<8x128xf32>
    %31 = math.sqrt %26 : vector<8x128xf32>
    %cst_7 = arith.constant 3.000000e+00 : f32
    %32 = vector.broadcast %cst_7 : f32 to vector<8x128xf32>
    %33 = arith.subf %31, %32 : vector<8x128xf32>
    %34 = arith.select %28, %30, %33 : vector<8x128xi1>, vector<8x128xf32>
    %cst_8 = arith.constant 2.81022636E-8 : f32
    %cst_9 = arith.constant -2.00214257E-4 : f32
    %35 = vector.broadcast %cst_8 : f32 to vector<8x128xf32>
    %36 = vector.broadcast %cst_9 : f32 to vector<8x128xf32>
    %37 = arith.select %28, %35, %36 : vector<8x128xi1>, vector<8x128xf32>
    %cst_10 = arith.constant 3.43273939E-7 : f32
    %cst_11 = arith.constant 1.00950558E-4 : f32
    %38 = vector.broadcast %cst_10 : f32 to vector<8x128xf32>
    %39 = vector.broadcast %cst_11 : f32 to vector<8x128xf32>
    %40 = arith.select %28, %38, %39 : vector<8x128xi1>, vector<8x128xf32>
    %41 = arith.mulf %37, %34 : vector<8x128xf32>
    %42 = arith.addf %40, %41 : vector<8x128xf32>
    %cst_12 = arith.constant -3.5233877E-6 : f32
    %cst_13 = arith.constant 0.00134934322 : f32
    %43 = vector.broadcast %cst_12 : f32 to vector<8x128xf32>
    %44 = vector.broadcast %cst_13 : f32 to vector<8x128xf32>
    %45 = arith.select %28, %43, %44 : vector<8x128xi1>, vector<8x128xf32>
    %46 = arith.mulf %42, %34 : vector<8x128xf32>
    %47 = arith.addf %45, %46 : vector<8x128xf32>
    %cst_14 = arith.constant -4.39150654E-6 : f32
    %cst_15 = arith.constant -0.00367342844 : f32
    %48 = vector.broadcast %cst_14 : f32 to vector<8x128xf32>
    %49 = vector.broadcast %cst_15 : f32 to vector<8x128xf32>
    %50 = arith.select %28, %48, %49 : vector<8x128xi1>, vector<8x128xf32>
    %51 = arith.mulf %47, %34 : vector<8x128xf32>
    %52 = arith.addf %50, %51 : vector<8x128xf32>
    %cst_16 = arith.constant 2.1858087E-4 : f32
    %cst_17 = arith.constant 0.00573950773 : f32
    %53 = vector.broadcast %cst_16 : f32 to vector<8x128xf32>
    %54 = vector.broadcast %cst_17 : f32 to vector<8x128xf32>
    %55 = arith.select %28, %53, %54 : vector<8x128xi1>, vector<8x128xf32>
    %56 = arith.mulf %52, %34 : vector<8x128xf32>
    %57 = arith.addf %55, %56 : vector<8x128xf32>
    %cst_18 = arith.constant -0.00125372503 : f32
    %cst_19 = arith.constant -0.0076224613 : f32
    %58 = vector.broadcast %cst_18 : f32 to vector<8x128xf32>
    %59 = vector.broadcast %cst_19 : f32 to vector<8x128xf32>
    %60 = arith.select %28, %58, %59 : vector<8x128xi1>, vector<8x128xf32>
    %61 = arith.mulf %57, %34 : vector<8x128xf32>
    %62 = arith.addf %60, %61 : vector<8x128xf32>
    %cst_20 = arith.constant -0.00417768164 : f32
    %cst_21 = arith.constant 0.00943887047 : f32
    %63 = vector.broadcast %cst_20 : f32 to vector<8x128xf32>
    %64 = vector.broadcast %cst_21 : f32 to vector<8x128xf32>
    %65 = arith.select %28, %63, %64 : vector<8x128xi1>, vector<8x128xf32>
    %66 = arith.mulf %62, %34 : vector<8x128xf32>
    %67 = arith.addf %65, %66 : vector<8x128xf32>
    %cst_22 = arith.constant 0.246640727 : f32
    %cst_23 = arith.constant 1.00167406 : f32
    %68 = vector.broadcast %cst_22 : f32 to vector<8x128xf32>
    %69 = vector.broadcast %cst_23 : f32 to vector<8x128xf32>
    %70 = arith.select %28, %68, %69 : vector<8x128xi1>, vector<8x128xf32>
    %71 = arith.mulf %67, %34 : vector<8x128xf32>
    %72 = arith.addf %70, %71 : vector<8x128xf32>
    %cst_24 = arith.constant 1.50140941 : f32
    %cst_25 = arith.constant 2.83297682 : f32
    %73 = vector.broadcast %cst_24 : f32 to vector<8x128xf32>
    %74 = vector.broadcast %cst_25 : f32 to vector<8x128xf32>
    %75 = arith.select %28, %73, %74 : vector<8x128xi1>, vector<8x128xf32>
    %76 = arith.mulf %72, %34 : vector<8x128xf32>
    %77 = arith.addf %75, %76 : vector<8x128xf32>
    %78 = math.absf %20 : vector<8x128xf32>
    %cst_26 = arith.constant 1.000000e+00 : f32
    %79 = vector.broadcast %cst_26 : f32 to vector<8x128xf32>
    %80 = arith.cmpf oeq, %78, %79 : vector<8x128xf32>
    %cst_27 = arith.constant 0x7F800000 : f32
    %81 = vector.broadcast %cst_27 : f32 to vector<8x128xf32>
    %82 = arith.mulf %81, %20 : vector<8x128xf32>
    %83 = arith.mulf %77, %20 : vector<8x128xf32>
    %84 = arith.select %80, %82, %83 : vector<8x128xi1>, vector<8x128xf32>
    %cst_28 = arith.constant 1.41421354 : f32
    %85 = vector.broadcast %cst_28 : f32 to vector<8x128xf32>
    %86 = arith.mulf %85, %84 : vector<8x128xf32>
    %c0_29 = arith.constant 0 : index
    %c0_30 = arith.constant 0 : index
    %87 = vector.load %arg3[%c0_29, %c0_30] : memref<8x128xf32, #tpu.memory_space<vmem>>, vector<8x128xf32>
    %c0_31 = arith.constant 0 : index
    %c0_32 = arith.constant 0 : index
    %88 = vector.load %arg4[%c0_31, %c0_32] : memref<8x128xf32, #tpu.memory_space<vmem>>, vector<8x128xf32>
    %cst_33 = arith.constant 0.000000e+00 : f32
    %89 = vector.broadcast %cst_33 : f32 to vector<8x128xf32>
    %90 = arith.maximumf %88, %89 : vector<8x128xf32>
    %91 = vector.broadcast %cst_33 : f32 to vector<8x128xf32>
    %92 = arith.subf %88, %91 : vector<8x128xf32>
    %93 = arith.cmpf one, %92, %92 : vector<8x128xf32>
    %94 = vector.broadcast %cst_33 : f32 to vector<8x128xf32>
    %95 = arith.addf %88, %94 : vector<8x128xf32>
    %96 = math.absf %92 : vector<8x128xf32>
    %cst_34 = arith.constant 0.000000e+00 : f32
    %97 = vector.broadcast %cst_34 : f32 to vector<8x128xf32>
    %98 = arith.subf %97, %96 : vector<8x128xf32>
    %99 = math.exp %98 : vector<8x128xf32>
    %100 = math.log1p %99 : vector<8x128xf32>
    %101 = arith.addf %90, %100 : vector<8x128xf32>
    %102 = arith.select %93, %95, %101 : vector<8x128xi1>, vector<8x128xf32>
    %cst_35 = arith.constant 9.99999993E-9 : f32
    %103 = vector.broadcast %cst_35 : f32 to vector<8x128xf32>
    %104 = arith.addf %102, %103 : vector<8x128xf32>
    %105 = arith.mulf %104, %86 : vector<8x128xf32>
    %106 = arith.addf %87, %105 : vector<8x128xf32>
    %c0_36 = arith.constant 0 : index
    %c0_37 = arith.constant 0 : index
    %107 = vector.load %arg5[%c0_36, %c0_37] : memref<8x128xf32, #tpu.memory_space<vmem>>, vector<8x128xf32>
    tpu.vector_store %arg5[%c0_36, %c0_37], %106 {strides = array<i32>} : memref<8x128xf32, #tpu.memory_space<vmem>>, vector<8x128xf32>,
    %cst_38 = arith.constant 0.000000e+00 : f32
    %108 = vector.broadcast %cst_38 : f32 to vector<8x128xf32>
    %109 = arith.subf %87, %108 : vector<8x128xf32>
    %110 = math.log %104 : vector<8x128xf32>
    %cst_39 = arith.constant 2.000000e+00 : f32
    %111 = vector.broadcast %cst_39 : f32 to vector<8x128xf32>
    %112 = arith.mulf %111, %110 : vector<8x128xf32>
    %cst_40 = arith.constant -1.000000e+00 : f32
    %113 = vector.broadcast %cst_40 : f32 to vector<8x128xf32>
    %114 = arith.subf %113, %112 : vector<8x128xf32>
    %115 = arith.mulf %104, %104 : vector<8x128xf32>
    %116 = arith.mulf %109, %109 : vector<8x128xf32>
    %117 = arith.addf %115, %116 : vector<8x128xf32>
    %cst_41 = arith.constant 1.000000e+00 : f32
    %118 = vector.broadcast %cst_41 : f32 to vector<8x128xf32>
    %119 = arith.mulf %117, %118 : vector<8x128xf32>
    %120 = arith.addf %114, %119 : vector<8x128xf32>
    %cst_42 = arith.constant dense<0.000000e+00> : vector<128xf32>
    %121 = vector.multi_reduction <add>, %120, %cst_42 [0] : vector<8x128xf32> to vector<128xf32>
    %122 = vector.shape_cast %121 : vector<128xf32> to vector<1x128xf32>
    %cst_43 = arith.constant 5.000000e-01 : f32
    %123 = vector.broadcast %cst_43 : f32 to vector<1x128xf32>
    %124 = arith.mulf %123, %122 : vector<1x128xf32>
    %125 = vector.shape_cast %124 : vector<1x128xf32> to vector<1x1x128xf32>
    %c0_44 = arith.constant 0 : index
    %c0_45 = arith.constant 0 : index
    %c0_46 = arith.constant 0 : index
    %126 = vector.load %arg6[%c0_44, %c0_45, %c0_46] : memref<1x1x128xf32, #tpu.memory_space<vmem>>, vector<1x1x128xf32>
    tpu.vector_store %arg6[%c0_44, %c0_45, %c0_46], %125 {strides = array<i32>} : memref<1x1x128xf32, #tpu.memory_space<vmem>>, vector<1x1x128xf32>,
    return
  }
  func.func @transform_0(%arg0: i32, %arg1: i32, %arg2: memref<1xi32, #tpu.memory_space<smem>>) -> (i32, i32) {
    %c0_i32 = arith.constant 0 : i32
    return %arg0, %arg1 : i32, i32
  }
  func.func @transform_1(%arg0: i32, %arg1: i32, %arg2: memref<1xi32, #tpu.memory_space<smem>>) -> (i32, i32) {
    %c0_i32 = arith.constant 0 : i32
    return %arg0, %arg1 : i32, i32
  }
  func.func @transform_2(%arg0: i32, %arg1: i32, %arg2: memref<1xi32, #tpu.memory_space<smem>>) -> (i32, i32) {
    %c0_i32 = arith.constant 0 : i32
    return %arg0, %arg1 : i32, i32
  }
  func.func @transform_3(%arg0: i32, %arg1: i32, %arg2: memref<1xi32, #tpu.memory_space<smem>>) -> (i32, i32, i32) {
    %c0_i32 = arith.constant 0 : i32
    %c0_i32_0 = arith.constant 0 : i32
    return %arg0, %c0_i32, %arg1 : i32, i32, i32
  }
}

module attributes {stable_mosaic.version = 11 : i64} {
  func.func @_eps_kernel(%arg0: i32, %arg1: i32, %arg2: memref<24x256xf32, #tpu.memory_space<vmem>>, %arg3: memref<24x256xf32, #tpu.memory_space<vmem>>, %arg4: memref<24x256xf32, #tpu.memory_space<vmem>>, %arg5: memref<24x256xf32, #tpu.memory_space<vmem>>, %arg6: memref<1x1x256xf32, #tpu.memory_space<vmem>>) attributes {dimension_semantics = [#tpu.dimension_semantics<parallel>, #tpu.dimension_semantics<parallel>], iteration_bounds = array<i64: 2, 1>, scalar_prefetch = 0 : i64, scratch_operands = 0 : i64, tpu.core_type = #tpu.core_type<tc>, window_params = [{transform_indices = @transform_0, window_bounds = array<i64: 24, 256>}, {transform_indices = @transform_1, window_bounds = array<i64: 24, 256>}, {transform_indices = @transform_2, window_bounds = array<i64: 24, 256>}, {transform_indices = @transform_3, window_bounds = array<i64: 24, 256>}, {transform_indices = @transform_4, window_bounds = array<i64: 1, 1, 256>}]} {
    %c0 = arith.constant 0 : index
    %c0_0 = arith.constant 0 : index
    %0 = vector.load %arg2[%c0, %c0_0] : memref<24x256xf32, #tpu.memory_space<vmem>>, vector<24x256xf32>
    %c0_1 = arith.constant 0 : index
    %c0_2 = arith.constant 0 : index
    %1 = vector.load %arg3[%c0_1, %c0_2] : memref<24x256xf32, #tpu.memory_space<vmem>>, vector<24x256xf32>
    %c0_3 = arith.constant 0 : index
    %c0_4 = arith.constant 0 : index
    %2 = vector.load %arg4[%c0_3, %c0_4] : memref<24x256xf32, #tpu.memory_space<vmem>>, vector<24x256xf32>
    %cst = arith.constant 0.000000e+00 : f32
    %3 = vector.broadcast %cst : f32 to vector<24x256xf32>
    %4 = arith.maximumf %1, %3 : vector<24x256xf32>
    %5 = vector.broadcast %cst : f32 to vector<24x256xf32>
    %6 = arith.subf %1, %5 : vector<24x256xf32>
    %7 = arith.cmpf one, %6, %6 : vector<24x256xf32>
    %8 = vector.broadcast %cst : f32 to vector<24x256xf32>
    %9 = arith.addf %1, %8 : vector<24x256xf32>
    %10 = math.absf %6 : vector<24x256xf32>
    %cst_5 = arith.constant 0.000000e+00 : f32
    %11 = vector.broadcast %cst_5 : f32 to vector<24x256xf32>
    %12 = arith.subf %11, %10 : vector<24x256xf32>
    %13 = math.exp %12 : vector<24x256xf32>
    %14 = math.log1p %13 : vector<24x256xf32>
    %15 = arith.addf %4, %14 : vector<24x256xf32>
    %16 = arith.select %7, %9, %15 : vector<24x256xi1>, vector<24x256xf32>
    %cst_6 = arith.constant 9.99999993E-9 : f32
    %17 = vector.broadcast %cst_6 : f32 to vector<24x256xf32>
    %18 = arith.addf %16, %17 : vector<24x256xf32>
    %19 = arith.mulf %18, %2 : vector<24x256xf32>
    %20 = arith.addf %0, %19 : vector<24x256xf32>
    %c0_7 = arith.constant 0 : index
    %c0_8 = arith.constant 0 : index
    %21 = vector.load %arg5[%c0_7, %c0_8] : memref<24x256xf32, #tpu.memory_space<vmem>>, vector<24x256xf32>
    tpu.vector_store %arg5[%c0_7, %c0_8], %20 {strides = array<i32>} : memref<24x256xf32, #tpu.memory_space<vmem>>, vector<24x256xf32>,
    %cst_9 = arith.constant 0.000000e+00 : f32
    %22 = vector.broadcast %cst_9 : f32 to vector<24x256xf32>
    %23 = arith.subf %0, %22 : vector<24x256xf32>
    %24 = math.log %18 : vector<24x256xf32>
    %cst_10 = arith.constant 2.000000e+00 : f32
    %25 = vector.broadcast %cst_10 : f32 to vector<24x256xf32>
    %26 = arith.mulf %25, %24 : vector<24x256xf32>
    %cst_11 = arith.constant -5.60517025 : f32
    %27 = vector.broadcast %cst_11 : f32 to vector<24x256xf32>
    %28 = arith.subf %27, %26 : vector<24x256xf32>
    %29 = arith.mulf %18, %18 : vector<24x256xf32>
    %30 = arith.mulf %23, %23 : vector<24x256xf32>
    %31 = arith.addf %29, %30 : vector<24x256xf32>
    %cst_12 = arith.constant 1.000000e+02 : f32
    %32 = vector.broadcast %cst_12 : f32 to vector<24x256xf32>
    %33 = arith.mulf %31, %32 : vector<24x256xf32>
    %34 = arith.addf %28, %33 : vector<24x256xf32>
    %cst_13 = arith.constant dense<0.000000e+00> : vector<256xf32>
    %35 = vector.multi_reduction <add>, %34, %cst_13 [0] : vector<24x256xf32> to vector<256xf32>
    %36 = vector.shape_cast %35 : vector<256xf32> to vector<1x256xf32>
    %cst_14 = arith.constant 5.000000e-01 : f32
    %37 = vector.broadcast %cst_14 : f32 to vector<1x256xf32>
    %38 = arith.mulf %37, %36 : vector<1x256xf32>
    %39 = vector.shape_cast %38 : vector<1x256xf32> to vector<1x1x256xf32>
    %c0_15 = arith.constant 0 : index
    %c0_16 = arith.constant 0 : index
    %c0_17 = arith.constant 0 : index
    %40 = vector.load %arg6[%c0_15, %c0_16, %c0_17] : memref<1x1x256xf32, #tpu.memory_space<vmem>>, vector<1x1x256xf32>
    tpu.vector_store %arg6[%c0_15, %c0_16, %c0_17], %39 {strides = array<i32>} : memref<1x1x256xf32, #tpu.memory_space<vmem>>, vector<1x1x256xf32>,
    return
  }
  func.func @transform_0(%arg0: i32, %arg1: i32) -> (i32, i32) {
    %c0_i32 = arith.constant 0 : i32
    return %arg0, %arg1 : i32, i32
  }
  func.func @transform_1(%arg0: i32, %arg1: i32) -> (i32, i32) {
    %c0_i32 = arith.constant 0 : i32
    return %arg0, %arg1 : i32, i32
  }
  func.func @transform_2(%arg0: i32, %arg1: i32) -> (i32, i32) {
    %c0_i32 = arith.constant 0 : i32
    return %arg0, %arg1 : i32, i32
  }
  func.func @transform_3(%arg0: i32, %arg1: i32) -> (i32, i32) {
    %c0_i32 = arith.constant 0 : i32
    return %arg0, %arg1 : i32, i32
  }
  func.func @transform_4(%arg0: i32, %arg1: i32) -> (i32, i32, i32) {
    %c0_i32 = arith.constant 0 : i32
    %c0_i32_0 = arith.constant 0 : i32
    return %arg0, %c0_i32, %arg1 : i32, i32, i32
  }
}

</mosaic_0001>

<bundles_post_ra>
// kernel: tpu_custom_call.1
= control target key start
LH: loop header
LB: loop body
LE: loop exit
PB: predicated region body
PF: predicated region fallthrough
CT: control target
= control target key end

     0   :  { %11 = vsyncpa [#allocation5], 0  ;;  %s510_s0 = inlined_call_operand.<no memory space> [shape: s32[1], index: 0, kind: input, shape index: {}]   ;;  %s511_s1 = inlined_call_operand.hbm [shape: f32[8,128], index: 1, kind: input, shape index: {}]   ;;  %s512_s2 = inlined_call_operand.hbm [shape: f32[8,128], index: 2, kind: input, shape index: {}]   ;;  %s513_s3 = inlined_call_operand.hbm [shape: f32[8,128], index: 3, kind: output, shape index: {0}]   ;;  %s514_s4 = inlined_call_operand.hbm [shape: f32[1,1,128], index: 4, kind: output, shape index: {1}]  }
   0x1   :  { %12 = vsyncpa [#allocation8], 0 }
   0x2   :  { %13 = vsyncpa [#allocation6], 0 }
   0x3   :  { %14 = vsyncpa [#allocation11], 0  ;;  %s412_s15 = smov [#allocation4]   ;;  %s413_s17 = smov [#allocation7]  }
   0x4   :  { %s21_s16 = sshll.u32 %s412_s15, 4  ;;  %s31_s18 = sshll.u32 %s413_s17, 4  ;;  %s22_s16 = int_to_ptr.vmem [resolvable:$true] %s21_s16  ;;  %s32_s18 = int_to_ptr.vmem [resolvable:$true] %s31_s18 }
   0x5   :  { %s332_s19 = scalar_lea.vmem %s22_s16, 128  ;;  %p337_p1 = scmp.lt.s32.totalorder %s22_s16, %s22_s16 }
   0x6   :  { %p333_p0 = scmp.ne.s32.totalorder %s22_s16, %s332_s19  ;;  %p338_p2 = scmp.lt.s32.totalorder %s332_s19, %s332_s19 }
   0x8   :  { %p339_p3 = por %p338_p2, %p337_p1 }
   0xa   :  { %p340_p4 = pnand %p339_p3, %p333_p0 }
   0xc   :  { %343 = shalt.err (!%p340_p4)
}
   0xd   :  { %24 = dma.hbm_to_vmem [thread:$0]  %s511_s1, 128, %s22_s16, [#allocation5]  }
   0xe   :  { %s352_s22 = scalar_lea.vmem %s32_s18, 128  ;;  %p357_p6 = scmp.lt.s32.totalorder %s32_s18, %s32_s18 }
   0xf   :  { %p353_p5 = scmp.ne.s32.totalorder %s32_s18, %s352_s22  ;;  %p358_p7 = scmp.lt.s32.totalorder %s352_s22, %s352_s22 }
  0x11   :  { %p359_p8 = por %p358_p7, %p357_p6 }
  0x13   :  { %p360_p9 = pnand %p359_p8, %p353_p5 }
  0x15   :  { %363 = shalt.err (!%p360_p9)
}
  0x16   :  { %34 = dma.hbm_to_vmem [thread:$0]  %s512_s2, 128, %s32_s18, [#allocation8]  }
  0x17   :  { %404 = dma.done.wait [#allocation5], 128  }
  0x18   :  { %405 = vsyncadd [#allocation5], 4294967168  ;;  %v44_v0 = vlaneseq  ;;  %v459_v1 = vstv %s510_s0 }
  0x19   :  { %406 = dma.done.wait [#allocation8], 128  }
  0x1a   :  { %407 = vsyncadd [#allocation8], 4294967168  ;;  %v48_v2 = vadd.s32 %v459_v1, %v44_v0  ;;  %v46_v17 = vxor.u32 %v459_v1, %v459_v1  ;;  %v229_v37 = vld [vmem:[#allocation7] sm:$0xff]  ;;  %s414_s0 = smov [#allocation10]  }
  0x1b   :  { %v233_v39 = vand.u32 2147483647, %v229_v37  ;;  %vm231_vm1 = vcmp.ne.f32.partialorder %v229_v37, %v229_v37  ;;  %s284_s1 = sshll.u32 %s414_s0, 4  ;;  %s285_s1 = int_to_ptr.vmem [resolvable:$true] %s284_s1 }
  0x1c   :  { %v49_v3 = vadd.s32 %v48_v2, %v48_v2  ;;  %v50_v4 = vshll.u32 %v48_v2, 13  ;;  %v51_v5 = vshrl.u32 %v48_v2, 19  ;;  %v464_v22 = vxor.u32 466688986, %v46_v17  ;;  %s364_s2 = scalar_lea.vmem %s285_s1, 16  ;;  %s368_s27 = scalar_lea.vmem %s285_s1, 32 }
  0x1d   :  { %v234_v43 = vsub.f32 0.0, %v233_v39  ;;  %v230_v17 = vmax.f32 %v229_v37, 0.0  ;;  %p365_p10 = scmp.ne.s32.totalorder %s285_s1, %s364_s2  ;;  %p369_p11 = scmp.lt.s32.totalorder %s285_s1, %s285_s1 }
  0x1e   :  { %v52_v6 = vor.u32 %v51_v5, %v50_v4  ;;  %p370_p12 = scmp.lt.s32.totalorder %s368_s27, %s364_s2 }
  0x1f   :  { %v235_v45 = vmul.f32 1.442695, %v234_v43 }
  0x20   :  { %v53_v7 = vxor.u32 %v52_v6, %v49_v3  ;;  %p371_p13 = por %p370_p12, %p369_p11 }
  0x21   :  { %314 = vpow2.f32 %v235_v45 }
  0x22   :  { %v54_v8 = vadd.s32 %v53_v7, %v49_v3  ;;  %v55_v9 = vshll.u32 %v53_v7, 15  ;;  %v56_v10 = vshrl.u32 %v53_v7, 17  ;;  %p372_p0 = pnand %p371_p13, %p365_p10 }
  0x24   :  { %v57_v11 = vor.u32 %v56_v10, %v55_v9 }
  0x26   :  { %v58_v12 = vxor.u32 %v57_v11, %v54_v8 }
  0x28   :  { %v59_v13 = vadd.s32 %v58_v12, %v54_v8  ;;  %v60_v14 = vshll.u32 %v58_v12, 26  ;;  %v61_v15 = vshrl.u32 %v58_v12, 6 }
  0x2a   :  { %v62_v16 = vor.u32 %v61_v15, %v60_v14 }
  0x2c   :  { %v63_v18 = vxor.u32 %v62_v16, %v59_v13 }
  0x2e   :  { %v64_v19 = vadd.s32 %v63_v18, %v59_v13  ;;  %v65_v20 = vshll.u32 %v63_v18, 6  ;;  %v66_v21 = vshrl.u32 %v63_v18, 26  ;;  %v315_v58 = vpop.eup %314 }
  0x2f   :  { %v237_v60 = vadd.f32 1.0, %v315_v58  ;;  %v240_v8 = vmul.f32 -0.5, %v315_v58  ;;  %v243_v12 = vand.u32 2147483647, %v315_v58 }
  0x30   :  { %v67_v23 = vor.u32 %v66_v21, %v65_v20  ;;  %v69_v25 = vadd.s32 %v64_v19, %v459_v1 }
  0x31   :  { %316 = vlog2.f32 %v237_v60  ;;  %v241_v10 = vadd.f32 1.0, %v240_v8  ;;  %vm244_vm0 = vcmp.lt.f32.partialorder %v243_v12, 0.0004427343 }
  0x32   :  { %v68_v24 = vxor.u32 %v67_v23, %v64_v19 }
  0x33   :  { %v242_v18 = vmul.f32 %v315_v58, %v241_v10 }
  0x34   :  { %v70_v26 = vadd.s32 %v68_v24, %v464_v22 }
  0x36   :  { %v71_v27 = vadd.s32 1, %v70_v26 }
  0x38   :  { %v72_v28 = vadd.s32 %v71_v27, %v69_v25  ;;  %v73_v29 = vshll.u32 %v71_v27, 17  ;;  %v74_v30 = vshrl.u32 %v71_v27, 15 }
  0x3a   :  { %v75_v31 = vor.u32 %v74_v30, %v73_v29 }
  0x3c   :  { %v76_v32 = vxor.u32 %v75_v31, %v72_v28 }
  0x3e   :  { %v77_v33 = vadd.s32 %v76_v32, %v72_v28  ;;  %v78_v34 = vshll.u32 %v76_v32, 29  ;;  %v79_v35 = vshrl.u32 %v76_v32, 3  ;;  %v317_v11 = vpop.eup %316 }
  0x3f   :  { %v239_v16 = vmul.f32 0.6931472, %v317_v11 }
  0x40   :  { %v80_v36 = vor.u32 %v79_v35, %v78_v34 }
  0x41   :  { %v245_v20 = vsel %vm244_vm0, %v242_v18, %v239_v16 }
  0x42   :  { %v81_v38 = vxor.u32 %v80_v36, %v77_v33  ;;  %v246_v23 = vadd.f32 %v245_v20, %v230_v17 }
  0x44   :  { %v82_v40 = vadd.s32 %v81_v38, %v77_v33  ;;  %v83_v41 = vshll.u32 %v81_v38, 16  ;;  %v84_v42 = vshrl.u32 %v81_v38, 16  ;;  %v247_v26 = vsel %vm231_vm1, %v229_v37, %v246_v23  ;;  %v475_v37 = vld [vmem:[#allocation4] sm:$0xff] }
  0x45   :  { %v472_v27 = vadd.f32 1e-08, %v247_v26 }
  0x46   :  { %v85_v44 = vor.u32 %v84_v42, %v83_v41 }
  0x47   :  { %318 = vlog2.f32 %v472_v27 }
  0x48   :  { %v86_v46 = vxor.u32 %v85_v44, %v82_v40 }
  0x4a   :  { %v87_v47 = vadd.s32 %v86_v46, %v82_v40  ;;  %v88_v48 = vshll.u32 %v86_v46, 24  ;;  %v89_v49 = vshrl.u32 %v86_v46, 8  ;;  %v256_v46 = vmul.f32 %v472_v27, %v472_v27 }
  0x4c   :  { %v90_v50 = vor.u32 %v89_v49, %v88_v48  ;;  %v92_v52 = vadd.s32 %v87_v47, %v464_v22 }
  0x4e   :  { %v91_v51 = vxor.u32 %v90_v50, %v87_v47  ;;  %v257_v47 = vmul.f32 %v475_v37, %v475_v37 }
  0x50   :  { %v93_v53 = vadd.s32 %v91_v51, %v459_v1  ;;  %v258_v50 = vadd.f32 %v257_v47, %v256_v46 }
  0x52   :  { %v94_v54 = vadd.s32 2, %v93_v53 }
  0x54   :  { %v95_v55 = vadd.s32 %v94_v54, %v92_v52  ;;  %v96_v56 = vshll.u32 %v94_v54, 13  ;;  %v97_v57 = vshrl.u32 %v94_v54, 19  ;;  %v319_v40 = vpop.eup %318 }
  0x55   :  { %v253_v44 = vmul.f32 0.6931472, %v319_v40 }
  0x56   :  { %v98_v59 = vor.u32 %v97_v57, %v96_v56 }
  0x57   :  { %v254_v48 = vmul.f32 2.0, %v253_v44 }
  0x58   :  { %v99_v61 = vxor.u32 %v98_v59, %v95_v55 }
  0x59   :  { %v255_v51 = vsub.f32 -1.0, %v254_v48 }
  0x5a   :  { %v100_v62 = vadd.s32 %v99_v61, %v95_v55  ;;  %v101_v63 = vshll.u32 %v99_v61, 15  ;;  %v102_v0 = vshrl.u32 %v99_v61, 17 }
  0x5b   :  { %v259_v55 = vadd.f32 %v258_v50, %v255_v51 }
  0x5c   :  { %v103_v2 = vor.u32 %v102_v0, %v101_v63 }
  0x5d   :  { %v260_v57 = vrot.slane %v259_v55, 4 }
  0x5e   :  { %v104_v3 = vxor.u32 %v103_v2, %v100_v62 }
  0x5f   :  { %v261_v59 = vadd.f32 %v260_v57, %v259_v55 }
  0x60   :  { %v105_v4 = vadd.s32 %v104_v3, %v100_v62  ;;  %v106_v5 = vshll.u32 %v104_v3, 26  ;;  %v107_v6 = vshrl.u32 %v104_v3, 6 }
  0x61   :  { %v262_v62 = vrot.slane %v261_v59, 2 }
  0x62   :  { %v108_v7 = vor.u32 %v107_v6, %v106_v5 }
  0x63   :  { %v263_v0 = vadd.f32 %v262_v62, %v261_v59 }
  0x64   :  { %v109_v9 = vxor.u32 %v108_v7, %v105_v4 }
  0x65   :  { %v264_v5 = vrot.slane %v263_v0, 1 }
  0x66   :  { %v110_v13 = vadd.s32 %v109_v9, %v105_v4  ;;  %v111_v14 = vshll.u32 %v109_v9, 6  ;;  %v112_v15 = vshrl.u32 %v109_v9, 26 }
  0x67   :  { %v265_v7 = vadd.f32 %v264_v5, %v263_v0 }
  0x68   :  { %v113_v19 = vor.u32 %v112_v15, %v111_v14  ;;  %v115_v24 = vadd.s32 %v110_v13, %v459_v1 }
  0x69   :  { %v266_v9 = vmul.f32 0.5, %v265_v7 }
  0x6a   :  { %v114_v21 = vxor.u32 %v113_v19, %v110_v13 }
  0x6b   :  { %267 = vst [vmem:[#allocation10] sm:$0x1] %v266_v9 }
  0x6c   :  { %v116_v25 = vadd.s32 %v114_v21, %v459_v1 }
  0x6e   :  { %v117_v28 = vadd.s32 3, %v116_v25 }
  0x70   :  { %v118_v29 = vadd.s32 %v117_v28, %v115_v24  ;;  %v119_v30 = vshll.u32 %v117_v28, 17  ;;  %v120_v31 = vshrl.u32 %v117_v28, 15 }
  0x72   :  { %v121_v32 = vor.u32 %v120_v31, %v119_v30 }
  0x74   :  { %v122_v33 = vxor.u32 %v121_v32, %v118_v29 }
  0x76   :  { %v123_v34 = vadd.s32 %v122_v33, %v118_v29  ;;  %v124_v35 = vshll.u32 %v122_v33, 29  ;;  %v125_v36 = vshrl.u32 %v122_v33, 3 }
  0x78   :  { %v126_v38 = vor.u32 %v125_v36, %v124_v35 }
  0x7a   :  { %v127_v39 = vxor.u32 %v126_v38, %v123_v34 }
  0x7c   :  { %v128_v41 = vadd.s32 %v127_v39, %v123_v34  ;;  %v129_v42 = vshll.u32 %v127_v39, 16  ;;  %v130_v43 = vshrl.u32 %v127_v39, 16 }
  0x7e   :  { %v131_v45 = vor.u32 %v130_v43, %v129_v42 }
  0x80   :  { %v132_v49 = vxor.u32 %v131_v45, %v128_v41 }
  0x82   :  { %v133_v52 = vadd.s32 %v132_v49, %v128_v41  ;;  %v134_v53 = vshll.u32 %v132_v49, 24  ;;  %v135_v54 = vshrl.u32 %v132_v49, 8 }
  0x84   :  { %v136_v56 = vor.u32 %v135_v54, %v134_v53  ;;  %v138_v60 = vadd.s32 %v133_v52, %v459_v1 }
  0x86   :  { %v137_v58 = vxor.u32 %v136_v56, %v133_v52 }
  0x88   :  { %v139_v61 = vadd.s32 %v137_v58, %v464_v22 }
  0x8a   :  { %v140_v63 = vadd.s32 4, %v139_v61 }
  0x8c   :  { %v141_v2 = vadd.s32 %v140_v63, %v138_v60  ;;  %v142_v3 = vshll.u32 %v140_v63, 13  ;;  %v143_v4 = vshrl.u32 %v140_v63, 19 }
  0x8e   :  { %v144_v6 = vor.u32 %v143_v4, %v142_v3 }
  0x90   :  { %v145_v8 = vxor.u32 %v144_v6, %v141_v2 }
  0x92   :  { %v146_v10 = vadd.s32 %v145_v8, %v141_v2  ;;  %v147_v11 = vshll.u32 %v145_v8, 15  ;;  %v148_v12 = vshrl.u32 %v145_v8, 17 }
  0x94   :  { %v149_v13 = vor.u32 %v148_v12, %v147_v11 }
  0x95   :  { %375 = shalt.err (!%p372_p0)
}
  0x96   :  { %287 = dma.vmem_to_hbm [thread:$0]  %s285_s1, 16, %s514_s4, [#allocation11]   ;;  %v150_v14 = vxor.u32 %v149_v13, %v146_v10  ;;  %v415_v56 = vmov -0.00020021426   ;;  %v416_v59 = vmov 0.00010095056  }
  0x97   :  { %v417_v63 = vmov 0.0013493432   ;;  %v418_v4 = vmov -0.0036734284   ;;  %v419_v8 = vmov 0.0057395077  }
  0x98   :  { %v151_v15 = vadd.s32 %v150_v14, %v146_v10  ;;  %v152_v16 = vshll.u32 %v150_v14, 26  ;;  %v153_v17 = vshrl.u32 %v150_v14, 6  ;;  %v420_v12 = vmov -0.0076224613   ;;  %s424_s4 = smov [#allocation9]  }
  0x99   :  { %s274_s30 = sshll.u32 %s424_s4, 4  ;;  %s275_s30 = int_to_ptr.vmem [resolvable:$true] %s274_s30 }
  0x9a   :  { %v154_v18 = vor.u32 %v153_v17, %v152_v16  ;;  %v421_v16 = vmov 0.0094388705   ;;  %s384_s5 = scalar_lea.vmem %s275_s30, 128  ;;  %p389_p2 = scmp.lt.s32.totalorder %s275_s30, %s275_s30 }
  0x9b   :  { %p385_p1 = scmp.ne.s32.totalorder %s275_s30, %s384_s5  ;;  %p390_p3 = scmp.lt.s32.totalorder %s384_s5, %s384_s5 }
  0x9c   :  { %v155_v19 = vxor.u32 %v154_v18, %v151_v15 }
  0x9d   :  { %p391_p4 = por %p390_p3, %p389_p2 }
  0x9e   :  { %v156_v20 = vadd.s32 %v155_v19, %v151_v15  ;;  %v157_v21 = vshll.u32 %v155_v19, 6  ;;  %v158_v23 = vshrl.u32 %v155_v19, 26 }
  0x9f   :  { %p392_p5 = pnand %p391_p4, %p385_p1 }
  0xa0   :  { %v159_v24 = vor.u32 %v158_v23, %v157_v21  ;;  %v161_v26 = vadd.s32 %v156_v20, %v464_v22 }
  0xa2   :  { %v160_v25 = vxor.u32 %v159_v24, %v156_v20  ;;  %v422_v20 = vmov 1.001674  }
  0xa4   :  { %v162_v28 = vadd.s32 %v160_v25, %v459_v1  ;;  %v423_v25 = vmov 2.8329768  }
  0xa6   :  { %v163_v29 = vadd.s32 5, %v162_v28 }
  0xa8   :  { %v164_v30 = vxor.u32 %v163_v29, %v161_v26 }
  0xaa   :  { %165 = set.rngseed %v164_v30 }
  0xab   :  { %v166_v31 = vrng }
  0xac   :  { %v167_v32 = vshrl.u32 %v166_v31, 9 }
  0xae   :  { %v168_v33 = vor.u32 1065353216, %v167_v32 }
  0xb0   :  { %v298_v34 = vadd.f32 -1.0, %v168_v33 }
  0xb2   :  { %v171_v35 = vmul.f32 2.0, %v298_v34 }
  0xb4   :  { %v172_v36 = vadd.f32 -0.99999994, %v171_v35 }
  0xb6   :  { %v488_v38 = vmax.f32 %v172_v36, -0.99999994 }
  0xb8   :  { %v174_v39 = vsub.f32 0.0, %v488_v38  ;;  %v222_v28 = vand.u32 2147483647, %v488_v38  ;;  %v224_v30 = vmul.f32 inf, %v488_v38 }
  0xba   :  { %v175_v40 = vmul.f32 %v174_v39, %v488_v38  ;;  %vm223_vm6 = vcmp.eq.f32.partialorder %v222_v28, 1.0 }
  0xbc   :  { %v176_v41 = vadd.f32 1.0, %v175_v40  ;;  %v179_v22 = vmul.f32 -0.5, %v175_v40  ;;  %v182_v1 = vand.u32 2147483647, %v175_v40 }
  0xbe   :  { %320 = vlog2.f32 %v176_v41  ;;  %v180_v42 = vadd.f32 1.0, %v179_v22  ;;  %vm183_vm2 = vcmp.lt.f32.partialorder %v182_v1, 0.0004427343 }
  0xc0   :  { %v181_v45 = vmul.f32 %v180_v42, %v175_v40 }
  0xcb   :  { %v321_v43 = vpop.eup %320 }
  0xcc   :  { %v178_v44 = vmul.f32 0.6931472, %v321_v43 }
  0xce   :  { %v184_v46 = vsel %vm183_vm2, %v181_v45, %v178_v44 }
  0xcf   :  { %v185_v47 = vsub.f32 0.0, %v184_v46 }
  0xd1   :  { %322 = vrsqrt.f32 %v185_v47  ;;  %vm190_vm3 = vcmp.eq.f32.partialorder %v185_v47, inf  ;;  %v193_v50 = vand.u32 2147483648, %v185_v47  ;;  %vm192_vm4 = vcmp.eq.f32.partialorder %v185_v47, 0.0 }
  0xd2   :  { %vm186_vm5 = vcmp.lt.f32.partialorder %v185_v47, 5.0  ;;  %v299_v53 = vadd.f32 -2.5, %v185_v47 }
  0xd3   :  { %v197_v57 = vsel %vm186_vm5, 2.8102264e-08, %v415_v56  ;;  %v198_v60 = vsel %vm186_vm5, 3.4327394e-07, %v416_v59  ;;  %v201_v0 = vsel %vm186_vm5, -3.5233877e-06, %v417_v63 }
  0xd4   :  { %v204_v5 = vsel %vm186_vm5, -4.3915065e-06, %v418_v4  ;;  %v207_v9 = vsel %vm186_vm5, 0.00021858087, %v419_v8  ;;  %v210_v13 = vsel %vm186_vm5, -0.001253725, %v420_v12 }
  0xd5   :  { %v213_v17 = vsel %vm186_vm5, -0.0041776816, %v421_v16  ;;  %v216_v21 = vsel %vm186_vm5, 0.24664073, %v422_v20  ;;  %v219_v26 = vsel %vm186_vm5, 1.5014094, %v423_v25 }
  0xde   :  { %v323_v48 = vpop.eup %322 }
  0xdf   :  { %v189_v49 = vmul.f32 %v323_v48, %v185_v47 }
  0xe1   :  { %v191_v51 = vsel %vm190_vm3, %v185_v47, %v189_v49 }
  0xe2   :  { %v194_v52 = vsel %vm192_vm4, %v193_v50, %v191_v51 }
  0xe3   :  { %v300_v54 = vadd.f32 -3.0, %v194_v52 }
  0xe5   :  { %v196_v55 = vsel %vm186_vm5, %v299_v53, %v300_v54 }
  0xe6   :  { %v199_v58 = vmul.f32 %v197_v57, %v196_v55 }
  0xe8   :  { %v200_v61 = vadd.f32 %v199_v58, %v198_v60 }
  0xea   :  { %v202_v62 = vmul.f32 %v200_v61, %v196_v55 }
  0xec   :  { %v203_v2 = vadd.f32 %v202_v62, %v201_v0 }
  0xee   :  { %v205_v3 = vmul.f32 %v203_v2, %v196_v55 }
  0xf0   :  { %v206_v6 = vadd.f32 %v205_v3, %v204_v5 }
  0xf2   :  { %v208_v7 = vmul.f32 %v206_v6, %v196_v55 }
  0xf4   :  { %v209_v10 = vadd.f32 %v208_v7, %v207_v9 }
  0xf6   :  { %v211_v11 = vmul.f32 %v209_v10, %v196_v55 }
  0xf8   :  { %v212_v14 = vadd.f32 %v211_v11, %v210_v13 }
  0xfa   :  { %v214_v15 = vmul.f32 %v212_v14, %v196_v55 }
  0xfc   :  { %v215_v18 = vadd.f32 %v214_v15, %v213_v17 }
  0xfe   :  { %v217_v19 = vmul.f32 %v215_v18, %v196_v55 }
 0x100   :  { %v218_v23 = vadd.f32 %v217_v19, %v216_v21 }
 0x102   :  { %v220_v24 = vmul.f32 %v218_v23, %v196_v55 }
 0x104   :  { %v221_v29 = vadd.f32 %v220_v24, %v219_v26 }
 0x106   :  { %v225_v31 = vmul.f32 %v221_v29, %v488_v38 }
 0x108   :  { %v226_v32 = vsel %vm223_vm6, %v224_v30, %v225_v31 }
 0x109   :  { %v227_v33 = vmul.f32 1.4142135, %v226_v32 }
 0x10b   :  { %v249_v34 = vmul.f32 %v472_v27, %v227_v33 }
 0x10d   :  { %v250_v35 = vadd.f32 %v249_v34, %v475_v37 }
 0x10f   :  { %251 = vst [vmem:[#allocation9] sm:$0xff] %v250_v35 }
 0x110   :  { %395 = shalt.err (!%p392_p5)
}
 0x111   :  { %277 = dma.vmem_to_hbm [thread:$0]  %s275_s30, 128, %s513_s3, [#allocation6]  }
 0x112   :  { %408 = dma.done.wait [#allocation6], 128  }
 0x113   :  { %409 = vsyncadd [#allocation6], 4294967168 }
 0x114   :  { %410 = dma.done.wait [#allocation11], 16  }
 0x115   :  { %411 = vsyncadd [#allocation11], 4294967280 }
 0x116   :  { %294 = vsyncpa [#allocation5], 1 }
 0x117   :  { %295 = vsyncpa [#allocation8], 1 }
 0x118   :  { %296 = vsyncpa [#allocation6], 1 }
 0x119   :  { %297 = vsyncpa [#allocation11], 1 }

// kernel: tpu_custom_call.1
= control target key start
LH: loop header
LB: loop body
LE: loop exit
PB: predicated region body
PF: predicated region fallthrough
CT: control target
= control target key end

     0   :  { %s1577_s0 = inlined_call_operand.hbm [shape: f32[48,256], index: 0, kind: input, shape index: {}]   ;;  %s1578_s1 = inlined_call_operand.hbm [shape: f32[48,256], index: 1, kind: input, shape index: {}]   ;;  %s1579_s2 = inlined_call_operand.hbm [shape: f32[48,256], index: 2, kind: input, shape index: {}]   ;;  %s1580_s3 = inlined_call_operand.hbm [shape: f32[48,256], index: 3, kind: output, shape index: {0}]   ;;  %s1581_s4 = inlined_call_operand.hbm [shape: f32[2,1,256], index: 4, kind: output, shape index: {1}]  }
   0x1   :  { %1588 = sst [smem:[#allocation19_spill]] %s1578_s1 }
   0x2   :  { %10 = vsyncpa [#allocation3], 0 }
   0x3   :  { %12 = vsyncpa [#allocation3 + $0x1], 0 }
   0x4   :  { %13 = vsyncpa [#allocation6], 0 }
   0x5   :  { %15 = vsyncpa [#allocation6 + $0x1], 0 }
   0x6   :  { %16 = vsyncpa [#allocation4], 0 }
   0x7   :  { %18 = vsyncpa [#allocation4 + $0x1], 0 }
   0x8   :  { %19 = vsyncpa [#allocation10], 0 }
   0x9   :  { %21 = vsyncpa [#allocation10 + $0x1], 0  ;;  %s1187_s15 = smov 0   ;;  %s1189_s16 = smov 0  }
   0xa   :  { %s1191_s17 = smov 0   ;;  %s1193_s18 = smov 0  }
   0xb   :  { %s1195_s19 = smov 0   ;;  %s1197_s20 = smov 0  }
   0xc LB: > { %1589 = sst [smem:[#allocation15_spill]] %s1146_s19  ;;  %s1218_s21 = sadd.s32 4294967295, %s1150_s20   ;;  %s1150_s20 = sphi %s1197_s20, %s27_s20   ;;  %s1146_s19 = sphi %s1195_s19, %s1618_s19   ;;  %s1142_s18 = sphi %s1193_s18, %s1617_s18   ;;  %s1138_s17 = sphi %s1191_s17, %s1621_s17   ;;  %s1134_s16 = sphi %s1189_s16, %s1620_s16   ;;  %s1130_s15 = sphi %s1187_s15, %s1619_s15  }
   0xd   : > { %s799_s22 = sadd.s32 4294967294, %s1150_s20   ;;  %s39_s23 = sadd.s32 1, %s1146_s19 }
   0xe   : > { %s48_s24 = sadd.s32 1, %s1138_s17  ;;  %p41_p0 = scmp.ge.s32.totalorder %s39_s23, 2 }
   0xf   : > { %p55_p1 = scmp.ne.s32.totalorder %s1138_s17, %s1134_s16  ;;  %p56_p2 = scmp.eq.s32.totalorder %s1150_s20, 0 }
  0x10   : > { %p61_p3 = scmp.ne.s32.totalorder %s1134_s16, %s1130_s15  ;;  %s1623_s23 = smov (%p41_p0, %s39_s23), 0 }
  0x11   : > { %1590 = sst [smem:[#allocation16_spill]] %s1623_s23  ;;  %p1230_p4 = por %p56_p2, %p55_p1 }
  0x12   : > { %p62_p5 = scmp.eq.s32.totalorder %s1218_s21, 0  ;;  %s43_s26 = ssub.s32 %s1146_s19, %s1623_s23 }
  0x13   : > { %p143_p6 = scmp.eq.s32.totalorder %s1218_s21, 1  ;;  %p46_p7 = scmp.eq.s32.totalorder %s43_s26, 0 }
  0x14   : > { %p1238_p8 = por %p62_p5, %p61_p3  ;;  %p149_p10 = scmp.eq.s32.totalorder %s799_s22, 1 }
  0x15   : > { %p1242_p9 = por %p143_p6, %p55_p1  ;;  %p861_p13 = scmp.lt.s32.totalorder %s1150_s20, 2 }
  0x16   : > { %s1247_s29 = scalar_select %p46_p7, %s1138_s17, %s48_s24  }
  0x17   : > { %p1249_p11 = por %p149_p10, %p61_p3  ;;  %s1582_s5 = sand.u32 1, %s1138_s17  }
  0x18   : > { %1594 = sst [smem:[#allocation17_spill]] %s1247_s29  ;;  %s1258_s6 = smul.u32 48, %s1582_s5 }
  0x19   : > { %s1595_s30 = scalar_select %p1249_p11, 1, 0 }
  0x1a   : > { %s1261_s7 = smul.u32 768, %s1146_s19  ;;  %p1265_p0 = pnand %p861_p13, %p1230_p4 }
  0x1b   : > { %1596 = sst [smem:[#allocation18_spill]] %s1595_s30  ;;  %s221_s9 = sand.u32 1, %s1150_s20  }
  0x1c   : > { %s1598_s1 = sld [smem:[#allocation19_spill]]  ;;  %s225_s13 = scalar_lea.vmem [#allocation5], %s1258_s6 }
  0x1d   : > { %s235_s14 = sshll.u32 %s225_s13, 4  ;;  %p808_p1 = scmp.ge.s32.totalorder %s1150_s20, 1  ;;  %s236_s14 = int_to_ptr.vmem [resolvable:$true] %s235_s14 }
  0x1e   : > { %p267_p2 = scmp.lt.s32.totalorder %s1150_s20, 3  ;;  %s1277_s22 = scalar_lea.sflag [#allocation6], %s221_s9 }
  0x1f   : > { %p954_p3 = pneg %p1265_p0  ;;  %s965_s24 = scalar_lea.vmem %s236_s14, 768 }
  0x20   : > { %p966_p4 = scmp.ne.s32.totalorder %s236_s14, %s965_s24  ;;  %s1152_s25 = smov [#allocation5]  }
  0x21   : > { %s970_s26 = sshll.u32 %s1152_s25, 4  ;;  %s971_s26 = int_to_ptr.vmem [resolvable:$false] %s970_s26 }
  0x22   : > { %s234_s12 = scalar_lea.hbm %s1598_s1, %s1261_s7  ;;  %p968_p5 = pnand %p966_p4, %p954_p3 }
  0x23   : > { %s972_s10 = scalar_lea.vmem %s971_s26, 1536  ;;  %p973_p7 = scmp.lt.s32.totalorder %s236_s14, %s971_s26 }
  0x24   : > { %p969_p6 = pneg %p968_p5  ;;  %p974_p10 = scmp.lt.s32.totalorder %s972_s10, %s965_s24 }
  0x26   : > { %p975_p13 = por %p974_p10, %p973_p7 }
  0x28   : > { %p976_p12 = pnand %p975_p13, %p969_p6 }
  0x2a   : > { %979 = shalt.err (!%p976_p12)
}
  0x2b   : > { %s1586_s11 = smov 256   ;;  %s1154_s9 = smov 16  }
  0x2c   : > { %850 = dma.hbm_to_vmem [thread:$0]  (!%p1265_p0), %s234_s12, 768, %s236_s14, %s1277_s22, %s1586_s11, %s1586_s11, %s1154_s9  }
  0x2d   : > { %p1294_p4 = pnand %p808_p1, %p267_p2  ;;  %s210_s26 = scalar_lea.hbm %s1577_s0, %s1261_s7 }
  0x2e   : > { %s201_s10 = scalar_lea.vmem [#allocation2], %s1258_s6  ;;  %s258_s19 = scalar_lea.hbm %s1579_s2, %s1261_s7 }
  0x2f   : > { %s211_s5 = sshll.u32 %s201_s10, 4  ;;  %s1600_s29 = sand.u32 1, %s1138_s17   ;;  %s212_s5 = int_to_ptr.vmem [resolvable:$true] %s211_s5 }
  0x30   : > { %s198_s30 = scalar_lea.sflag [#allocation3], %s1600_s29  ;;  %s993_s12 = scalar_lea.vmem %s212_s5, 768 }
  0x31   : > { %p994_p12 = scmp.ne.s32.totalorder %s212_s5, %s993_s12  ;;  %s1155_s14 = smov [#allocation2]  }
  0x32   : > { %s998_s11 = sshll.u32 %s1155_s14, 4  ;;  %s999_s11 = int_to_ptr.vmem [resolvable:$false] %s998_s11 }
  0x33   : > { %p996_p1 = pnand %p994_p12, %p954_p3  ;;  %s1000_s24 = scalar_lea.vmem %s999_s11, 1536 }
  0x34   : > { %p1001_p5 = scmp.lt.s32.totalorder %s212_s5, %s999_s11  ;;  %p1002_p6 = scmp.lt.s32.totalorder %s1000_s24, %s993_s12 }
  0x35   : > { %p997_p2 = pneg %p996_p1 }
  0x36   : > { %p1003_p7 = por %p1002_p6, %p1001_p5 }
  0x38   : > { %p1004_p10 = pnand %p1003_p7, %p997_p2 }
  0x3a   : > { %1007 = shalt.err (!%p1004_p10)
}
  0x3b   : > { %s1601_s1 = smov 256   ;;  %s249_s23 = scalar_lea.vmem [#allocation7], %s1258_s6 }
  0x3c   : > { %847 = dma.hbm_to_vmem [thread:$0]  (!%p1265_p0), %s210_s26, 768, %s212_s5, %s198_s30, %s1601_s1, %s1601_s1, %s1154_s9  }
  0x3d   : > { %s259_s29 = sshll.u32 %s249_s23, 4  ;;  %s1156_s11 = smov [#allocation7]   ;;  %s260_s29 = int_to_ptr.vmem [resolvable:$true] %s259_s29 }
  0x3e   : > { %s1021_s25 = scalar_lea.vmem %s260_s29, 768  ;;  %s1026_s10 = sshll.u32 %s1156_s11, 4  ;;  %s1027_s10 = int_to_ptr.vmem [resolvable:$false] %s1026_s10 }
  0x3f   : > { %p1022_p13 = scmp.ne.s32.totalorder %s260_s29, %s1021_s25  ;;  %s1028_s12 = scalar_lea.vmem %s1027_s10, 1536 }
  0x40   : > { %p1029_p2 = scmp.lt.s32.totalorder %s260_s29, %s1027_s10  ;;  %p1030_p5 = scmp.lt.s32.totalorder %s1028_s12, %s1021_s25 }
  0x41   : > { %p1024_p12 = pnand %p1022_p13, %p954_p3 }
  0x42   : > { %p1031_p6 = por %p1030_p5, %p1029_p2 }
  0x43   : > { %p1025_p1 = pneg %p1024_p12 }
  0x45   : > { %p1032_p7 = pnand %p1031_p6, %p1025_p1 }
  0x47   : > { %1035 = shalt.err (!%p1032_p7)
}
  0x48   : > { %853 = dma.hbm_to_vmem [thread:$0]  (!%p1265_p0), %s258_s19, 768, %s260_s29, %s1277_s22, %s1601_s1, %s1601_s1, %s1154_s9  }
  0x49   : > { %271 = sbr.rel (%p1294_p4) target bundleno = 204 (0xcc), region = 32  ;;  %s1335_s6 = sand.u32 (!%p1294_p4), 1, %s1134_s16  }
  0x4a   : > { %s1338_s8 = smul.u32 (!%p1294_p4), 48, %s1335_s6  ;;  %s274_s26 = scalar_lea.sflag (!%p1294_p4), [#allocation3], %s1335_s6 }
  0x4c   : > { %s1342_s14 = scalar_lea.vmem (!%p1294_p4), [#allocation2], %s1338_s8 }
  0x4e   : > { %1113 = dma.done.wait (%p1238_p8), %s274_s26, 768  }
  0x4f   : > { %1115 = vsyncadd (%p1238_p8), %s274_s26, 4294966528  ;;  %s282_s19 = sand.u32 1, %s1218_s21   ;;  %s286_s22 = scalar_lea.vmem [#allocation5], %s1338_s8 }
  0x50   : > { %s283_s7 = scalar_lea.sflag [#allocation6], %s282_s19 }
  0x51   : > { %1117 = dma.done.wait (%p1238_p8), %s283_s7, 1536  }
  0x52   : > { %1119 = vsyncadd (%p1238_p8), %s283_s7, 4294965760  ;;  %v1354_v0 = vld [vmem:[%s286_s22] sm:$0xff]  ;;  %v1357_v2 = vld [vmem:[%s286_s22 + $0x8] sm:$0xff]  ;;  %s1416_s21 = scalar_lea.vmem [#allocation7], %s1338_s8  ;;  %s1461_s27 = scalar_lea.vmem [#allocation8], %s1338_s8 }
  0x53   : > { %v380_v1 = vand.u32 2147483647, %v1354_v0  ;;  %v381_v3 = vand.u32 2147483647, %v1357_v2  ;;  %v1360_v4 = vld [vmem:[%s286_s22 + $0x10] sm:$0xff]  ;;  %v1363_v7 = vld [vmem:[%s286_s22 + $0x18] sm:$0xff]  ;;  %vm368_vm0 = vcmp.ne.f32.partialorder %v1354_v0, %v1354_v0  ;;  %vm369_vm1 = vcmp.ne.f32.partialorder %v1357_v2, %v1357_v2 }
  0x54   : > { %v382_v6 = vand.u32 2147483647, %v1360_v4  ;;  %v1365_v9 = vld [vmem:[%s286_s22 + $0x20] sm:$0xff]  ;;  %v383_v12 = vand.u32 2147483647, %v1363_v7  ;;  %v1369_v17 = vld [vmem:[%s286_s22 + $0x28] sm:$0xff]  ;;  %vm370_vm4 = vcmp.ne.f32.partialorder %v1360_v4, %v1360_v4  ;;  %vm371_vm6 = vcmp.ne.f32.partialorder %v1363_v7, %v1363_v7 }
  0x55   : > { %v386_v5 = vsub.f32 0.0, %v380_v1  ;;  %v387_v8 = vsub.f32 0.0, %v381_v3  ;;  %v384_v14 = vand.u32 2147483647, %v1365_v9  ;;  %v385_v20 = vand.u32 2147483647, %v1369_v17 }
  0x56   : > { %v388_v11 = vsub.f32 0.0, %v382_v6  ;;  %v389_v16 = vsub.f32 0.0, %v383_v12  ;;  %v362_v45 = vmax.f32 %v1354_v0, 0.0  ;;  %v363_v46 = vmax.f32 %v1357_v2, 0.0  ;;  %v360_v58 = vld [vmem:[%s1416_s21 + $0x20] sm:$0xff]  ;;  %s611_s9 = sshll.u32 %s1461_s27, 4  ;;  %s1488_s9 = int_to_ptr.vmem [resolvable:$true] %s611_s9 }
  0x57   : > { %v392_v10 = vmul.f32 1.442695, %v386_v5  ;;  %v394_v13 = vmul.f32 1.442695, %v387_v8  ;;  %v390_v18 = vsub.f32 0.0, %v384_v14  ;;  %v391_v22 = vsub.f32 0.0, %v385_v20 }
  0x58   : > { %v396_v15 = vmul.f32 1.442695, %v388_v11  ;;  %v398_v19 = vmul.f32 1.442695, %v389_v16  ;;  %v364_v49 = vmax.f32 %v1360_v4, 0.0  ;;  %v365_v63 = vmax.f32 %v1363_v7, 0.0 }
  0x59   : > { %916 = vpow2.f32 %v392_v10  ;;  %v400_v21 = vmul.f32 1.442695, %v390_v18  ;;  %v402_v23 = vmul.f32 1.442695, %v391_v22  ;;  %v366_v18 = vmax.f32 %v1365_v9, 0.0  ;;  %v356_v20 = vld [vmem:[%s1416_s21] sm:$0xff] }
  0x5a   : > { %918 = vpow2.f32 %v394_v13  ;;  %vm372_vm10 = vcmp.ne.f32.partialorder %v1365_v9, %v1365_v9  ;;  %vm373_vm11 = vcmp.ne.f32.partialorder %v1369_v17, %v1369_v17  ;;  %s829_s13 = smul.u32 768, %s1142_s18  ;;  %s590_s29 = scalar_lea.sflag [#allocation4], %s1335_s6 }
  0x5b   : > { %920 = vpow2.f32 %v396_v15  ;;  %s1036_s25 = scalar_lea.vmem %s1488_s9, 768  ;;  %s1157_s11 = smov [#allocation8]  }
  0x5c   : > { %922 = vpow2.f32 %v398_v19  ;;  %s1499_s23 = scalar_lea.hbm %s1580_s3, %s829_s13  ;;  %p1037_p8 = scmp.ne.s32.totalorder %s1488_s9, %s1036_s25 }
  0x5d   : > { %924 = vpow2.f32 %v400_v21  ;;  %s1040_s10 = sshll.u32 %s1157_s11, 4  ;;  %s1041_s10 = int_to_ptr.vmem [resolvable:$false] %s1040_s10 }
  0x5e   : > { %926 = vpow2.f32 %v402_v23  ;;  %p1038_p0 = pnand %p1037_p8, %p1242_p9  ;;  %s1042_s12 = scalar_lea.vmem %s1041_s10, 1536 }
  0x5f   : > { %p1043_p4 = scmp.lt.s32.totalorder %s1488_s9, %s1041_s10  ;;  %p1044_p10 = scmp.lt.s32.totalorder %s1042_s12, %s1036_s25 }
  0x60   : > { %p1039_p3 = pneg %p1038_p0 }
  0x61   : > { %p1045_p13 = por %p1044_p10, %p1043_p4 }
  0x63   : > { %p1046_p12 = pnand %p1045_p13, %p1039_p3 }
  0x66   : > { %v917_v24 = vpop.eup %916 }
  0x67   : > { %v919_v25 = vpop.eup %918  ;;  %v404_v26 = vadd.f32 1.0, %v917_v24  ;;  %v407_v33 = vmul.f32 -0.5, %v917_v24  ;;  %v410_v41 = vand.u32 2147483647, %v917_v24 }
  0x68   : > { %v921_v27 = vpop.eup %920  ;;  %v413_v28 = vadd.f32 1.0, %v919_v25  ;;  %v416_v36 = vmul.f32 -0.5, %v919_v25  ;;  %v419_v43 = vand.u32 2147483647, %v919_v25 }
  0x69   : > { %928 = vlog2.f32 %v404_v26  ;;  %v422_v29 = vadd.f32 1.0, %v921_v27  ;;  %v923_v30 = vpop.eup %922  ;;  %v425_v37 = vmul.f32 -0.5, %v921_v27  ;;  %v408_v39 = vadd.f32 1.0, %v407_v33  ;;  %v357_v26 = vld [vmem:[%s1416_s21 + $0x8] sm:$0xff] }
  0x6a   : > { %930 = vlog2.f32 %v413_v28  ;;  %v1372_v31 = vpop.eup %924  ;;  %v431_v32 = vadd.f32 1.0, %v923_v30  ;;  %v434_v40 = vmul.f32 -0.5, %v923_v30  ;;  %v417_v42 = vadd.f32 1.0, %v416_v36 }
  0x6b   : > { %932 = vlog2.f32 %v422_v29  ;;  %v440_v34 = vadd.f32 1.0, %v1372_v31  ;;  %v1375_v35 = vpop.eup %926  ;;  %v426_v44 = vadd.f32 1.0, %v425_v37  ;;  %v428_v47 = vand.u32 2147483647, %v921_v27 }
  0x6c   : > { %934 = vlog2.f32 %v431_v32  ;;  %v449_v38 = vadd.f32 1.0, %v1375_v35  ;;  %v409_v48 = vmul.f32 %v917_v24, %v408_v39  ;;  %v435_v50 = vadd.f32 1.0, %v434_v40  ;;  %v344_v39 = vld [vmem:[%s1342_s14] sm:$0xff] }
  0x6d   : > { %936 = vlog2.f32 %v440_v34  ;;  %vm1385_vm2 = vcmp.lt.f32.partialorder %v410_v41, 0.0004427343  ;;  %v418_v53 = vmul.f32 %v919_v25, %v417_v42  ;;  %v437_v54 = vand.u32 2147483647, %v923_v30  ;;  %v345_v42 = vld [vmem:[%s1342_s14 + $0x8] sm:$0xff] }
  0x6e   : > { %938 = vlog2.f32 %v449_v38  ;;  %v443_v55 = vmul.f32 -0.5, %v1372_v31  ;;  %vm1390_vm3 = vcmp.lt.f32.partialorder %v419_v43, 0.0004427343  ;;  %v427_v59 = vmul.f32 %v921_v27, %v426_v44  ;;  %v359_v44 = vld [vmem:[%s1416_s21 + $0x18] sm:$0xff] }
  0x6f   : > { %vm1396_vm5 = vcmp.lt.f32.partialorder %v428_v47, 0.0004427343  ;;  %v436_v5 = vmul.f32 %v923_v30, %v435_v50  ;;  %v452_v6 = vmul.f32 -0.5, %v1375_v35  ;;  %vm1408_vm7 = vcmp.lt.f32.partialorder %v437_v54, 0.0004427343  ;;  %v346_v47 = vld [vmem:[%s1342_s14 + $0x10] sm:$0xff] }
  0x70   : > { %v444_v13 = vadd.f32 1.0, %v443_v55  ;;  %v446_v23 = vand.u32 2147483647, %v1372_v31  ;;  %v455_v24 = vand.u32 2147483647, %v1375_v35 }
  0x71   : > { %v453_v29 = vadd.f32 1.0, %v452_v6  ;;  %v348_v6 = vld [vmem:[%s1342_s14 + $0x20] sm:$0xff] }
  0x72   : > { %v445_v34 = vmul.f32 %v1372_v31, %v444_v13  ;;  %vm1447_vm8 = vcmp.lt.f32.partialorder %v446_v23, 0.0004427343  ;;  %vm1456_vm9 = vcmp.lt.f32.partialorder %v455_v24, 0.0004427343 }
  0x76   : > { %v929_v51 = vpop.eup %928 }
  0x77   : > { %v931_v56 = vpop.eup %930  ;;  %v406_v57 = vmul.f32 0.6931472, %v929_v51 }
  0x78   : > { %v933_v60 = vpop.eup %932  ;;  %v415_v61 = vmul.f32 0.6931472, %v931_v56 }
  0x79   : > { %v412_v1 = vsel %vm1385_vm2, %v409_v48, %v406_v57  ;;  %v424_v3 = vmul.f32 0.6931472, %v933_v60  ;;  %v935_v8 = vpop.eup %934 }
  0x7a   : > { %v458_v10 = vadd.f32 %v412_v1, %v362_v45  ;;  %v421_v11 = vsel %vm1390_vm3, %v418_v53, %v415_v61  ;;  %v433_v16 = vmul.f32 0.6931472, %v935_v8  ;;  %v937_v19 = vpop.eup %936  ;;  %v454_v45 = vmul.f32 %v1375_v35, %v453_v29  ;;  %v347_v53 = vld [vmem:[%s1342_s14 + $0x18] sm:$0xff]  ;;  %v361_v61 = vld [vmem:[%s1416_s21 + $0x28] sm:$0xff] }
  0x7b   : > { %v459_v14 = vadd.f32 %v421_v11, %v363_v46  ;;  %v430_v15 = vsel %vm1396_vm5, %v427_v59, %v424_v3  ;;  %v442_v37 = vmul.f32 0.6931472, %v937_v19  ;;  %v939_v38 = vpop.eup %938  ;;  %v524_v1 = vmul.f32 %v344_v39, %v344_v39 }
  0x7c   : > { %v464_v21 = vsel %vm368_vm0, %v1354_v0, %v458_v10  ;;  %v460_v22 = vadd.f32 %v430_v15, %v364_v49  ;;  %v439_v28 = vsel %vm1408_vm7, %v436_v5, %v433_v16  ;;  %v358_v0 = vld [vmem:[%s1416_s21 + $0x10] sm:$0xff]  ;;  %v367_v49 = vmax.f32 %v1369_v17, 0.0 }
  0x7d   : > { %v470_v25 = vadd.f32 1e-08, %v464_v21  ;;  %v465_v27 = vsel %vm369_vm1, %v1357_v2, %v459_v14  ;;  %v461_v33 = vadd.f32 %v439_v28, %v365_v63  ;;  %v448_v35 = vsel %vm1447_vm8, %v445_v34, %v442_v37  ;;  %v349_v14 = vld [vmem:[%s1342_s14 + $0x28] sm:$0xff] }
  0x7e   : > { %v1432_v30 = vadd.f32 1e-08, %v465_v27  ;;  %v466_v32 = vsel %vm370_vm4, %v1360_v4, %v460_v22  ;;  %v451_v51 = vmul.f32 0.6931472, %v939_v38  ;;  %v462_v54 = vadd.f32 %v448_v35, %v366_v18 }
  0x7f   : > { %v476_v36 = vmul.f32 %v470_v25, %v356_v20  ;;  %940 = vlog2.f32 %v470_v25  ;;  %v472_v2 = vadd.f32 1e-08, %v466_v32  ;;  %v467_v4 = vsel %vm371_vm6, %v1363_v7, %v461_v33 }
  0x80   : > { %v477_v40 = vmul.f32 %v1432_v30, %v357_v26  ;;  %942 = vlog2.f32 %v1432_v30  ;;  %v473_v48 = vadd.f32 1e-08, %v467_v4  ;;  %v457_v55 = vsel %vm1456_vm9, %v454_v45, %v451_v51 }
  0x81   : > { %v482_v31 = vadd.f32 %v476_v36, %v344_v39  ;;  %v478_v43 = vmul.f32 %v472_v2, %v358_v0  ;;  %944 = vlog2.f32 %v472_v2  ;;  %v463_v57 = vadd.f32 %v457_v55, %v367_v49 }
  0x82   : > { %v483_v46 = vadd.f32 %v477_v40, %v345_v42  ;;  %v479_v52 = vmul.f32 %v473_v48, %v359_v44  ;;  %946 = vlog2.f32 %v473_v48  ;;  %v468_v59 = vsel %vm372_vm10, %v1365_v9, %v462_v54 }
  0x83   : > { %488 = vst [vmem:[%s1461_s27] sm:$0xff] %v482_v31  ;;  %v484_v7 = vadd.f32 %v478_v43, %v346_v47  ;;  %v1479_v60 = vadd.f32 1e-08, %v468_v59  ;;  %v469_v62 = vsel %vm373_vm11, %v1369_v17, %v463_v57  ;;  %v518_v5 = vmul.f32 %v470_v25, %v470_v25 }
  0x84   : > { %489 = vst [vmem:[%s1461_s27 + $0x8] sm:$0xff] %v483_v46  ;;  %v485_v56 = vadd.f32 %v479_v52, %v347_v53  ;;  %v1483_v63 = vadd.f32 1e-08, %v469_v62  ;;  %v525_v9 = vmul.f32 %v345_v42, %v345_v42  ;;  %v520_v10 = vmul.f32 %v472_v2, %v472_v2 }
  0x85   : > { %490 = vst [vmem:[%s1461_s27 + $0x10] sm:$0xff] %v484_v7  ;;  %v480_v3 = vmul.f32 %v1479_v60, %v360_v58  ;;  %948 = vlog2.f32 %v1479_v60  ;;  %v526_v11 = vmul.f32 %v346_v47, %v346_v47  ;;  %v527_v12 = vmul.f32 %v347_v53, %v347_v53 }
  0x86   : > { %491 = vst [vmem:[%s1461_s27 + $0x18] sm:$0xff] %v485_v56  ;;  %v481_v8 = vmul.f32 %v1483_v63, %v361_v61  ;;  %950 = vlog2.f32 %v1483_v63  ;;  %v519_v18 = vmul.f32 %v1432_v30, %v1432_v30  ;;  %v521_v19 = vmul.f32 %v473_v48, %v473_v48 }
  0x87   : > { %v486_v13 = vadd.f32 %v480_v3, %v348_v6  ;;  %v530_v23 = vadd.f32 %v524_v1, %v518_v5  ;;  %v532_v26 = vadd.f32 %v526_v11, %v520_v10 }
  0x88   : > { %v487_v20 = vadd.f32 %v481_v8, %v349_v14 }
  0x89   : > { %492 = vst [vmem:[%s1461_s27 + $0x20] sm:$0xff] %v486_v13 }
  0x8a   : > { %493 = vst [vmem:[%s1461_s27 + $0x28] sm:$0xff] %v487_v20 }
  0x8c   : > { %v941_v17 = vpop.eup %940 }
  0x8d   : > { %v943_v15 = vpop.eup %942  ;;  %v495_v16 = vmul.f32 0.6931472, %v941_v17 }
  0x8e   : > { %v945_v21 = vpop.eup %944  ;;  %v497_v22 = vmul.f32 0.6931472, %v943_v15 }
  0x8f   : > { %v499_v24 = vmul.f32 0.6931472, %v945_v21  ;;  %v506_v25 = vmul.f32 2.0, %v495_v16 }
  0x90   : > { %1049 = shalt.err (!%p1046_p12)
}
  0x91   : > { %s1050_s30 = scalar_lea.hbm %s1499_s23, 768  ;;  %s1054_s26 = scalar_lea.hbm %s1580_s3, 1536 }
  0x92   : > { %p1051_p1 = scmp.ne.s32.totalorder %s1499_s23, %s1050_s30  ;;  %p1055_p6 = scmp.lt.s32.totalorder %s1499_s23, %s1580_s3 }
  0x93   : > { %p1056_p7 = scmp.lt.s32.totalorder %s1054_s26, %s1050_s30 }
  0x94   : > { %p1052_p2 = pnand %p1051_p1, %p1242_p9 }
  0x95   : > { %p1057_p8 = por %p1056_p7, %p1055_p6 }
  0x96   : > { %p1053_p5 = pneg %p1052_p2 }
  0x98   : > { %p1058_p0 = pnand %p1057_p8, %p1053_p5 }
  0x9a   : > { %1061 = shalt.err (!%p1058_p0)
}
  0x9b   : > { %s1158_s7 = smov 256   ;;  %s1159_s22 = smov 16   ;;  %v947_v27 = vpop.eup %946  ;;  %v507_v28 = vmul.f32 2.0, %v497_v22  ;;  %v531_v29 = vadd.f32 %v525_v9, %v519_v18  ;;  %v508_v30 = vmul.f32 2.0, %v499_v24  ;;  %v533_v0 = vadd.f32 %v527_v12, %v521_v19 }
  0x9c   : > { %840 = dma.vmem_to_hbm [thread:$0]  (%p1242_p9), %s1488_s9, 768, %s1499_s23, %s590_s29, %s1158_s7, %s1158_s7, %s1159_s22   ;;  %v501_v32 = vmul.f32 0.6931472, %v947_v27  ;;  %v522_v33 = vmul.f32 %v1479_v60, %v1479_v60  ;;  %v528_v34 = vmul.f32 %v348_v6, %v348_v6  ;;  %v536_v36 = vmul.f32 100.0, %v530_v23  ;;  %v949_v45 = vpop.eup %948 }
  0x9d   : > { %v523_v2 = vmul.f32 %v1483_v63, %v1483_v63  ;;  %v529_v37 = vmul.f32 %v349_v14, %v349_v14  ;;  %v512_v38 = vsub.f32 -5.6051702, %v506_v25  ;;  %v514_v39 = vsub.f32 -5.6051702, %v508_v30  ;;  %v951_v47 = vpop.eup %950  ;;  %s809_s21 = sshll.u32 %s1335_s6, 1  ;;  %s825_s13 = sshll.u32 %s1142_s18, 5 }
  0x9e   : > { %v538_v40 = vmul.f32 100.0, %v532_v26  ;;  %v509_v4 = vmul.f32 2.0, %v501_v32  ;;  %v513_v41 = vsub.f32 -5.6051702, %v507_v28  ;;  %v537_v31 = vmul.f32 100.0, %v531_v29  ;;  %s334_s27 = scalar_lea.vmem [#allocation9], %s809_s21  ;;  %s628_s23 = scalar_lea.hbm %s1581_s4, %s825_s13 }
  0x9f   : > { %v539_v42 = vmul.f32 100.0, %v533_v0  ;;  %v534_v44 = vadd.f32 %v528_v34, %v522_v33  ;;  %v535_v46 = vadd.f32 %v529_v37, %v523_v2  ;;  %v542_v48 = vadd.f32 %v536_v36, %v512_v38  ;;  %s630_s9 = sshll.u32 %s334_s27, 4  ;;  %s595_s29 = scalar_lea.sflag [#allocation10], %s1335_s6  ;;  %s1532_s9 = int_to_ptr.vmem [resolvable:$true] %s630_s9 }
  0xa0   : > { %v515_v43 = vsub.f32 -5.6051702, %v509_v4  ;;  %v544_v49 = vadd.f32 %v538_v40, %v514_v39  ;;  %v503_v50 = vmul.f32 0.6931472, %v949_v45  ;;  %v543_v7 = vadd.f32 %v537_v31, %v513_v41  ;;  %s1062_s25 = scalar_lea.vmem %s1532_s9, 32  ;;  %s1161_s18 = smov [#allocation9]  }
  0xa1   : > { %v505_v51 = vmul.f32 0.6931472, %v951_v47  ;;  %v540_v53 = vmul.f32 100.0, %v534_v44  ;;  %v541_v55 = vmul.f32 100.0, %v535_v46  ;;  %v1160_v17 = vmov 1966171168   ;;  %p1063_p3 = scmp.ne.s32.totalorder %s1532_s9, %s1062_s25 }
  0xa2   : > { %v545_v35 = vadd.f32 %v539_v42, %v515_v43  ;;  %v510_v52 = vmul.f32 2.0, %v503_v50  ;;  %v548_v56 = vadd.f32 %v544_v49, %v542_v48  ;;  %v570_v10 = vunpack.c.l.s4 %v1160_v17  ;;  %s1066_s11 = sshll.u32 %s1161_s18, 4  ;;  %s1067_s11 = int_to_ptr.vmem [resolvable:$false] %s1066_s11 }
  0xa3   : > { %v511_v54 = vmul.f32 2.0, %v505_v51  ;;  %v572_v11 = vlaneseq  ;;  %p1064_p4 = pnand %p1063_p3, %p1242_p9  ;;  %s1068_s10 = scalar_lea.vmem %s1067_s11, 64 }
  0xa4   : > { %v516_v57 = vsub.f32 -5.6051702, %v510_v52  ;;  %v556_v58 = vadd.f32 %v545_v35, %v543_v7  ;;  %v571_v16 = vunpack.c.0.s8 %v570_v10  ;;  %p1069_p13 = scmp.lt.s32.totalorder %s1532_s9, %s1067_s11  ;;  %p1070_p12 = scmp.lt.s32.totalorder %s1068_s10, %s1062_s25 }
  0xa5   : > { %v517_v59 = vsub.f32 -5.6051702, %v511_v54  ;;  %v573_v18 = vshrl.u32 %v572_v11, 7  ;;  %vm586_vm12 = vcmp.lt.s32.totalorder %v572_v11, 256  ;;  %p1065_p10 = pneg %p1064_p4 }
  0xa6   : > { %v546_v60 = vadd.f32 %v540_v53, %v516_v57  ;;  %p1071_p1 = por %p1070_p12, %p1069_p13 }
  0xa7   : > { %v547_v61 = vadd.f32 %v541_v55, %v517_v59  ;;  %v574_v23 = vsub.s32 %v571_v16, %v573_v18 }
  0xa8   : > { %v549_v62 = vadd.f32 %v548_v56, %v546_v60  ;;  %p1072_p2 = pnand %p1071_p1, %p1065_p10 }
  0xa9   : > { %v557_v63 = vadd.f32 %v556_v58, %v547_v61 }
  0xaa   : > { %v550_v1 = vrot.slane %v549_v62, 4 }
  0xab   : > { %v558_v3 = vrot.slane %v557_v63, 4 }
  0xac   : > { %v551_v5 = vadd.f32 %v550_v1, %v549_v62 }
  0xad   : > { %v559_v9 = vadd.f32 %v558_v3, %v557_v63 }
  0xae   : > { %v552_v6 = vrot.slane %v551_v5, 2 }
  0xaf   : > { %v560_v8 = vrot.slane %v559_v9, 2 }
  0xb0   : > { %v553_v12 = vadd.f32 %v552_v6, %v551_v5 }
  0xb1   : > { %v561_v13 = vadd.f32 %v560_v8, %v559_v9 }
  0xb2   : > { %v554_v14 = vrot.slane %v553_v12, 1 }
  0xb3   : > { %v562_v15 = vrot.slane %v561_v13, 1 }
  0xb4   : > { %v555_v19 = vadd.f32 %v554_v14, %v553_v12 }
  0xb5   : > { %v563_v20 = vadd.f32 %v562_v15, %v561_v13 }
  0xb6   : > { %v564_v21 = vmul.f32 0.5, %v555_v19 }
  0xb7   : > { %v565_v22 = vmul.f32 0.5, %v563_v20 }
  0xb9   : > { %v568_v24 = vcombine.low %v564_v21, %v565_v22 }
  0xbb   : > { %v575_v25 = vrot.slane %v568_v24, %v574_v23 }
  0xbd   : > { %v582_v26 = vrot.slane %v575_v25, %v574_v23 }
  0xbf   : > { %588 = vst.msk [vmem:[%s334_s27] sm:$0x3] %vm586_vm12, %v582_v26 }
  0xc0   : > { %1075 = shalt.err (!%p1072_p2)
}
  0xc1   : > { %s1076_s12 = scalar_lea.hbm %s628_s23, 32  ;;  %s1080_s5 = scalar_lea.hbm %s1581_s4, 64 }
  0xc2   : > { %p1077_p5 = scmp.ne.s32.totalorder %s628_s23, %s1076_s12  ;;  %p1081_p8 = scmp.lt.s32.totalorder %s628_s23, %s1581_s4 }
  0xc3   : > { %p1082_p0 = scmp.lt.s32.totalorder %s1080_s5, %s1076_s12 }
  0xc4   : > { %p1078_p6 = pnand %p1077_p5, %p1242_p9 }
  0xc5   : > { %p1083_p3 = por %p1082_p0, %p1081_p8 }
  0xc6   : > { %p1079_p7 = pneg %p1078_p6 }
  0xc8   : > { %p1084_p4 = pnand %p1083_p3, %p1079_p7 }
  0xca   : > { %1087 = shalt.err (!%p1084_p4)
}
  0xcb   : > { %841 = dma.vmem_to_hbm [thread:$0]  (%p1242_p9), %s1532_s9, 32, %s628_s23, %s595_s29  }
  0xcc PF: > { %s642_s19 = sand.u32 1, %s1130_s15   ;;  %p1615_p10 = scmp.ge.s32.totalorder %s1150_s20, 2 }
  0xcd   : > { %s643_s7 = scalar_lea.sflag [#allocation4], %s642_s19 }
  0xce   : > { %p855_p13 = pnand %p1615_p10, %p1249_p11 }
  0xd0   : > { %p856_p12 = pneg %p855_p13 }
  0xd2   : > { %1121 = dma.done.wait (%p856_p12), %s643_s7, 768  }
  0xd3   : > { %1123 = vsyncadd (%p856_p12), %s643_s7, 4294966528  ;;  %s652_s22 = scalar_lea.sflag [#allocation10], %s642_s19 }
  0xd4   : > { %1125 = dma.done.wait (%p856_p12), %s652_s22, 32  }
  0xd5   : > { %1127 = vsyncadd (%p856_p12), %s652_s22, 4294967264  ;;  %s27_s20 = sadd.s32 1, %s1150_s20   ;;  %s1616_s28 = sld [smem:[#allocation17_spill]] }
  0xd6   : > { %p24_p1 = scmp.ge.s32.totalorder %s27_s20, 4   ;;  %s1617_s18 = sld [smem:[#allocation15_spill]] }
  0xd7   : > { %s1618_s19 = sld [smem:[#allocation16_spill]]  ;;  %s1619_s15 = smov %s1134_s16 }
  0xd8   : > { %s1620_s16 = smov %s1138_s17  ;;  %26 = sbr.rel (!%p24_p1) target bundleno = 12 (0xc), region = 118 }
  0xdb   : > { %s1621_s17 = smov %s1616_s28 }
  0xdd   :  { %657 = vsyncpa [#allocation3], 1 }
  0xde   :  { %659 = vsyncpa [#allocation3 + $0x1], 1 }
  0xdf   :  { %660 = vsyncpa [#allocation6], 1 }
  0xe0   :  { %662 = vsyncpa [#allocation6 + $0x1], 1 }
  0xe1   :  { %663 = vsyncpa [#allocation4], 1 }
  0xe2   :  { %665 = vsyncpa [#allocation4 + $0x1], 1 }
  0xe3   :  { %666 = vsyncpa [#allocation10], 1 }
  0xe4   :  { %668 = vsyncpa [#allocation10 + $0x1], 1 }

</bundles_post_ra>
